<compile_context>
chip_gen: v7x
topology: tpu7x:2x2x1
jax: 0.10.0
libtpu: 0.0.40
codegen_flags: <defaults>
</compile_context>

<pallas_src>
import functools

import jax
import jax.numpy as jnp
from jax.experimental import pallas as pl
from jax.experimental.pallas import tpu as pltpu

HIDDEN = 768          # = 3 * 16 * 16, forced by LayerNorm(768) after pool+flatten
LN_EPS = 1e-5         # PyTorch nn.LayerNorm default
LANE = 128
SUBLANE = 8


def _round_up(n, m):
    return (n + m - 1) // m * m


def _vmem_capacity_bytes():
    """Chip-aware VMEM capacity (v5e/v6e: 128 MiB, v7x: 64 MiB); conservative fallback."""
    try:
        info = pltpu.get_tpu_info()
        for attr in ("vmem_capacity_bytes", "vmem_size_bytes", "vmem_bytes"):
            v = getattr(info, attr, None)
            if v:
                return int(v)
    except Exception:
        pass
    return 64 << 20


def _weight_buffer_bytes(cls_pad):
    # w1 bf16 + w2 bf16 + b1 f32 (sublane-padded), double-buffered by the pipeliner.
    return 2 * (HIDDEN * HIDDEN * 2 + HIDDEN * cls_pad * 2 + SUBLANE * HIDDEN * 4)


def _step_vmem_bytes(tb, cls_pad):
    # double-buffered (TB,768) bf16 activation + (TB,cls_pad) bf16 output + resident weights.
    tb16 = _round_up(tb, 16)  # bf16 sublane packing pads the second-minor dim to 16
    return (2 * tb16 * HIDDEN * 2
            + 2 * tb16 * cls_pad * 2
            + _weight_buffer_bytes(cls_pad)
            + (2 << 20))


def _pick_batch_tile(batch, cls_pad, budget):
    """Largest batch tile within the chip VMEM budget; floor 128 rows once B >= 128."""
    b8 = _round_up(max(batch, 1), SUBLANE)
    if b8 <= 128:
        return b8                                  # tiny batch: single small tile
    tb = 2048
    while tb > 128 and (tb > b8 or _step_vmem_bytes(tb, cls_pad) > budget):
        tb //= 2
    tb = max(128, tb)
    # Keep >= 2 grid steps on large batches so v7x's 2 TensorCores share the parallel axis.
    b_pad = _round_up(b8, tb)
    if b_pad // tb < 2:
        tb = max(128, _round_up(b_pad // 2, 128))
    return tb


def _classify_head_kernel(xw_ref, w1_ref, b1_ref, w2_ref, out_ref):
    # xw_ref: (TB, 768) bf16 pooled+flattened activations (pool already done XLA-side in f32).
    x = xw_ref[...].astype(jnp.float32)

    # LayerNorm(768) statistics in f32 (affine folded into w1/b1).
    mu = jnp.mean(x, axis=-1, keepdims=True)
    var = jnp.mean(jnp.square(x - mu), axis=-1, keepdims=True)
    xn = (x - mu) * jax.lax.rsqrt(var + LN_EPS)

    # Linear(768,768) (LN-affine folded in) + bias + Tanh; bf16 MXU operands, f32 accumulate.
    h = jnp.dot(xn.astype(jnp.bfloat16), w1_ref[...],
                preferred_element_type=jnp.float32) + b1_ref[...]
    h = jnp.tanh(h)

    # Linear(768, classes_padded), bias=False; lane-dense bf16 store (sliced outside).
    out_ref[...] = jnp.dot(h.astype(jnp.bfloat16), w2_ref[...],
                           preferred_element_type=jnp.float32).astype(out_ref.dtype)


def classify_head(x, head_params, classes):
    """x: (B, 3, H, W) NCHW float32 with H, W multiples of 16 (exact adaptive-pool case)."""
    w1, b1, w2p = head_params
    B, C, H, W = x.shape
    assert C * 16 * 16 == HIDDEN, "classifyHead requires C*256 == 768 (C == 3)"
    assert H % 16 == 0 and W % 16 == 0
    kh, kw = H // 16, W // 16
    cls_pad = w2p.shape[1]

    # AdaptiveAvgPool2d((16,16)) + Flatten as a fused XLA reduce in f32.
    # Flatten order f = c*256 + i*16 + j falls out of this reshape with no transpose.
    pooled = x.reshape(B, C, 16, kh, 16, kw).mean(axis=(3, 5)).reshape(B, HIDDEN)
    xw = pooled.astype(jnp.bfloat16)

    vmem_cap = _vmem_capacity_bytes()
    budget = int(vmem_cap * 0.72)                      # ~46 MiB on v7x, ~92 MiB on v5e/v6e
    TB = _pick_batch_tile(B, cls_pad, budget)
    B_pad = _round_up(max(B, TB), TB)
    if B_pad != B:
        xw = jnp.pad(xw, ((0, B_pad - B), (0, 0)))

    vmem_est = _step_vmem_bytes(TB, cls_pad)
    vmem_limit = int(min(max(vmem_est, 32 << 20), int(vmem_cap * 0.78)))

    weight_hbm_bytes = HIDDEN * HIDDEN * 2 + HIDDEN * cls_pad * 2 + HIDDEN * 4
    flops = 2 * B_pad * HIDDEN * (HIDDEN + cls_pad) + 8 * B_pad * HIDDEN
    bytes_accessed = B_pad * HIDDEN * 2 + weight_hbm_bytes + B_pad * cls_pad * 2

    def wspec(shape):
        return pl.BlockSpec(shape, lambda i: tuple(0 for _ in shape))

    out = pl.pallas_call(
        _classify_head_kernel,
        out_shape=jax.ShapeDtypeStruct((B_pad, cls_pad), jnp.bfloat16),
        grid=(B_pad // TB,),
        in_specs=[
            pl.BlockSpec((TB, HIDDEN), lambda i: (i, 0)),   # streamed activation tile
            wspec((HIDDEN, HIDDEN)),                        # w1 bf16 (LN-affine folded, resident)
            wspec((1, HIDDEN)),                             # b1 f32  (resident)
            wspec((HIDDEN, cls_pad)),                       # w2 bf16 (resident, N padded to 128)
        ],
        out_specs=pl.BlockSpec((TB, cls_pad), lambda i: (i, 0)),
        compiler_params=pltpu.CompilerParams(
            dimension_semantics=("parallel",),
            vmem_limit_bytes=vmem_limit,
        ),
        cost_estimate=pl.CostEstimate(
            flops=int(flops),
            transcendentals=int(B_pad * (HIDDEN + 1)),
            bytes_accessed=int(bytes_accessed),
        ),
    )(xw, w1, b1, w2p)

    return out[:B, :classes].astype(jnp.float32)


def sample_backward_process(x):
    # TODO(synk): IndependentConditionalFlowModel + DiT flow-ODE sampling are external
    # dependencies not defined in the provided source — treated as identity here.
    return x


def generative_classify_forward(x, head_params, classes):
    images = sample_backward_process(x)
    return classify_head(images, head_params, classes)


def init_params(key, classes):
    """Raw parameters in PyTorch layout: LayerNorm ones/zeros, Linear weights normal(std=0.02)
    stored (out_features, in_features), b1 uniform(+-1/sqrt(768)) (nn.Linear default)."""
    k1, k2, k3 = jax.random.split(key, 3)
    gamma = jnp.ones((HIDDEN,), jnp.float32)
    beta = jnp.zeros((HIDDEN,), jnp.float32)
    w1 = 0.02 * jax.random.normal(k1, (HIDDEN, HIDDEN), jnp.float32)       # (out, in)
    bound = 1.0 / (HIDDEN ** 0.5)
    b1 = jax.random.uniform(k3, (HIDDEN,), jnp.float32, minval=-bound, maxval=bound)
    w2 = 0.02 * jax.random.normal(k2, (classes, HIDDEN), jnp.float32)      # (out, in), no bias
    return (gamma, beta, w1, b1, w2)


def prepare_head_params(params, classes):
    """Kernel-ready params: LN affine folded into Linear1, weights transposed to (in,out),
    cast to bf16, classifier N dim zero-padded to a multiple of 128 lanes."""
    gamma, beta, w1, b1, w2 = params
    w1_t = w1.T                                                    # (in, out)
    w1_f = (gamma[:, None] * w1_t).astype(jnp.bfloat16)            # fold LN scale
    b1_f = (b1 + beta @ w1_t).reshape(1, HIDDEN).astype(jnp.float32)  # fold LN shift
    cls_pad = _round_up(max(classes, 1), LANE)
    w2_t = w2.T                                                    # (in, classes)
    w2_p = jnp.zeros((HIDDEN, cls_pad), jnp.float32).at[:, :classes].set(w2_t)
    return (w1_f, b1_f, w2_p.astype(jnp.bfloat16))


if __name__ == "__main__":
    key = jax.random.PRNGKey(0)
    kx, kp = jax.random.split(key)

    B, C, H, W = 2, 3, 32, 32          # config.image_size == 32  (DiT_32 branch)
    classes = 10                        # config.classes

    x = jax.random.normal(kx, (B, C, H, W), dtype=jnp.float32)
    raw_params = init_params(kp, classes)
    head_params = prepare_head_params(raw_params, classes)

    fwd = jax.jit(functools.partial(generative_classify_forward, classes=classes))
    out = fwd(x, head_params)
    jax.block_until_ready(out)

    assert out.shape == (B, classes)
    assert out.dtype == jnp.float32
    assert bool(jnp.all(jnp.isfinite(out)))
    print("KERNEL_OK")
</pallas_src>

<mosaic_0001>
module attributes {stable_mosaic.version = 11 : i64} {
  func.func @_classify_head_kernel(%arg0: i32, %arg1: memref<8x768xbf16, #tpu.memory_space<vmem>>, %arg2: memref<768x768xbf16, #tpu.memory_space<vmem>>, %arg3: memref<1x768xf32, #tpu.memory_space<vmem>>, %arg4: memref<768x128xbf16, #tpu.memory_space<vmem>>, %arg5: memref<8x128xbf16, #tpu.memory_space<vmem>>) attributes {dimension_semantics = [#tpu.dimension_semantics<parallel>], iteration_bounds = array<i64: 1>, scalar_prefetch = 0 : i64, scratch_operands = 0 : i64, tpu.core_type = #tpu.core_type<tc>, window_params = [{transform_indices = @transform_0, window_bounds = array<i64: 8, 768>}, {pipeline_mode = #tpu.pipeline_mode<synchronous>, transform_indices = @transform_1, window_bounds = array<i64: 768, 768>}, {pipeline_mode = #tpu.pipeline_mode<synchronous>, transform_indices = @transform_2, window_bounds = array<i64: 1, 768>}, {pipeline_mode = #tpu.pipeline_mode<synchronous>, transform_indices = @transform_3, window_bounds = array<i64: 768, 128>}, {transform_indices = @transform_4, window_bounds = array<i64: 8, 128>}]} {
    %c0 = arith.constant 0 : index
    %c0_0 = arith.constant 0 : index
    %0 = vector.load %arg1[%c0, %c0_0] : memref<8x768xbf16, #tpu.memory_space<vmem>>, vector<8x768xbf16>
    %1 = arith.extf %0 : vector<8x768xbf16> to vector<8x768xf32>
    %cst = arith.constant dense<0.000000e+00> : vector<8xf32>
    %2 = vector.multi_reduction <add>, %1, %cst [1] : vector<8x768xf32> to vector<8xf32>
    %3 = vector.shape_cast %2 : vector<8xf32> to vector<8x1xf32>
    %cst_1 = arith.constant 7.680000e+02 : f32
    %4 = vector.broadcast %cst_1 : f32 to vector<8x1xf32>
    %5 = arith.divf %3, %4 : vector<8x1xf32>
    %6 = vector.broadcast %5 : vector<8x1xf32> to vector<8x768xf32>
    %7 = arith.subf %1, %6 : vector<8x768xf32>
    %8 = arith.mulf %7, %7 : vector<8x768xf32>
    %cst_2 = arith.constant dense<0.000000e+00> : vector<8xf32>
    %9 = vector.multi_reduction <add>, %8, %cst_2 [1] : vector<8x768xf32> to vector<8xf32>
    %10 = vector.shape_cast %9 : vector<8xf32> to vector<8x1xf32>
    %cst_3 = arith.constant 7.680000e+02 : f32
    %11 = vector.broadcast %cst_3 : f32 to vector<8x1xf32>
    %12 = arith.divf %10, %11 : vector<8x1xf32>
    %13 = vector.broadcast %5 : vector<8x1xf32> to vector<8x768xf32>
    %14 = arith.subf %1, %13 : vector<8x768xf32>
    %cst_4 = arith.constant 9.99999974E-6 : f32
    %15 = vector.broadcast %cst_4 : f32 to vector<8x1xf32>
    %16 = arith.addf %12, %15 : vector<8x1xf32>
    %17 = math.rsqrt %16 : vector<8x1xf32>
    %18 = vector.broadcast %17 : vector<8x1xf32> to vector<8x768xf32>
    %19 = arith.mulf %14, %18 : vector<8x768xf32>
    %20 = arith.truncf %19 : vector<8x768xf32> to vector<8x768xbf16>
    %c0_5 = arith.constant 0 : index
    %c0_6 = arith.constant 0 : index
    %21 = vector.load %arg2[%c0_5, %c0_6] : memref<768x768xbf16, #tpu.memory_space<vmem>>, vector<768x768xbf16>
    %cst_7 = arith.constant dense<0.000000e+00> : vector<8x768xf32>
    %22 = tpu.matmul %20, %21, %cst_7 {dimension_numbers = #tpu.dot_dimension_numbers<[1], [0], [0], [1], [0, 0, 1, 1], [], []>} : vector<8x768xbf16>, vector<768x768xbf16>, vector<8x768xf32> -> vector<8x768xf32>
    %c0_8 = arith.constant 0 : index
    %c0_9 = arith.constant 0 : index
    %23 = vector.load %arg3[%c0_8, %c0_9] : memref<1x768xf32, #tpu.memory_space<vmem>>, vector<1x768xf32>
    %24 = vector.broadcast %23 : vector<1x768xf32> to vector<8x768xf32>
    %25 = arith.addf %22, %24 : vector<8x768xf32>
    %26 = math.tanh %25 : vector<8x768xf32>
    %27 = arith.truncf %26 : vector<8x768xf32> to vector<8x768xbf16>
    %c0_10 = arith.constant 0 : index
    %c0_11 = arith.constant 0 : index
    %28 = vector.load %arg4[%c0_10, %c0_11] : memref<768x128xbf16, #tpu.memory_space<vmem>>, vector<768x128xbf16>
    %cst_12 = arith.constant dense<0.000000e+00> : vector<8x128xf32>
    %29 = tpu.matmul %27, %28, %cst_12 {dimension_numbers = #tpu.dot_dimension_numbers<[1], [0], [0], [1], [0, 0, 1, 1], [], []>} : vector<8x768xbf16>, vector<768x128xbf16>, vector<8x128xf32> -> vector<8x128xf32>
    %30 = arith.truncf %29 : vector<8x128xf32> to vector<8x128xbf16>
    %c0_13 = arith.constant 0 : index
    %c0_14 = arith.constant 0 : index
    %31 = vector.load %arg5[%c0_13, %c0_14] : memref<8x128xbf16, #tpu.memory_space<vmem>>, vector<8x128xbf16>
    tpu.vector_store %arg5[%c0_13, %c0_14], %30 {strides = array<i32>} : memref<8x128xbf16, #tpu.memory_space<vmem>>, vector<8x128xbf16>,
    return
  }
  func.func @transform_0(%arg0: i32) -> (i32, i32) {
    %c0_i32 = arith.constant 0 : i32
    %c0_i32_0 = arith.constant 0 : i32
    return %arg0, %c0_i32 : i32, i32
  }
  func.func @transform_1(%arg0: i32) -> (i32, i32) {
    %c0_i32 = arith.constant 0 : i32
    %c0_i32_0 = arith.constant 0 : i32
    %c0_i32_1 = arith.constant 0 : i32
    return %c0_i32, %c0_i32_0 : i32, i32
  }
  func.func @transform_2(%arg0: i32) -> (i32, i32) {
    %c0_i32 = arith.constant 0 : i32
    %c0_i32_0 = arith.constant 0 : i32
    %c0_i32_1 = arith.constant 0 : i32
    return %c0_i32, %c0_i32_0 : i32, i32
  }
  func.func @transform_3(%arg0: i32) -> (i32, i32) {
    %c0_i32 = arith.constant 0 : i32
    %c0_i32_0 = arith.constant 0 : i32
    %c0_i32_1 = arith.constant 0 : i32
    return %c0_i32, %c0_i32_0 : i32, i32
  }
  func.func @transform_4(%arg0: i32) -> (i32, i32) {
    %c0_i32 = arith.constant 0 : i32
    %c0_i32_0 = arith.constant 0 : i32
    return %arg0, %c0_i32 : i32, i32
  }
}

</mosaic_0001>

<bundles_post_ra>
// kernel: generative_classify_forward.1
= control target key start
LH: loop header
LB: loop body
LE: loop exit
PB: predicated region body
PF: predicated region fallthrough
CT: control target
= control target key end

     0   :  { %s4804_s0 = inlined_call_operand.vmem [shape: bf16[8,768], index: 0, kind: input, shape index: {}]   ;;  %s4805_s1 = inlined_call_operand.vmem [shape: bf16[768,768], index: 1, kind: input, shape index: {}]   ;;  %s4806_s3 = inlined_call_operand.vmem [shape: bf16[768,128], index: 3, kind: input, shape index: {}]   ;;  %s4807_s2 = inlined_call_operand.vmem [shape: f32[1,768], index: 2, kind: input, shape index: {}]   ;;  %s4808_s4 = inlined_call_operand.vmem [shape: bf16[8,128], index: 4, kind: output, shape index: {}]  }
   0x1   :  { %v3673_v0 = vld [vmem:[%s4804_s0] sm:$0xff]  ;;  %v3678_v1 = vld [vmem:[%s4804_s0 + $0x8] sm:$0xff]  ;;  %v3686_v5 = vld [vmem:[%s4804_s0 + $0x10] sm:$0xff] }
   0x2   :  { %v21_v2 = vunpack.c.l.bf16 %v3673_v0  ;;  %v22_v3 = vunpack.c.h.bf16 %v3673_v0  ;;  %v23_v4 = vunpack.c.l.bf16 %v3678_v1  ;;  %v24_v6 = vunpack.c.h.bf16 %v3678_v1  ;;  %v3151_v14 = vld [vmem:[%s4805_s1 + $0x4] ss:$24 sps:$4 sm:$0xff]   ;;  %v3155_v16 = vld [vmem:[%s4805_s1] ss:$24 sps:$4 sm:$0xff]   ;;  %v3157_v18 = vld [vmem:[%s4805_s1 + $0x34] ss:$24 sps:$4 sm:$0xff]  }
   0x3   :  { %v25_v8 = vunpack.c.l.bf16 %v3686_v5  ;;  %v26_v10 = vunpack.c.h.bf16 %v3686_v5  ;;  %v3153_v15 = vld [vmem:[%s4805_s1 + $0x304] ss:$24 sps:$4 sm:$0xff]   ;;  %1830 = vmatprep.subr.bf16.mxu1 %v3151_v14  ;;  %v3156_v17 = vld [vmem:[%s4805_s1 + $0x300] ss:$24 sps:$4 sm:$0xff]   ;;  %v3159_v19 = vld [vmem:[%s4805_s1 + $0x334] ss:$24 sps:$4 sm:$0xff]  }
   0x4   :  { %v27_v7 = vadd.f32 %v22_v3, %v21_v2  ;;  %1871 = vmatprep.subr.bf16.mxu0 %v3153_v15  ;;  %1831 = vmatpush1.bf16.msra.mxu1 %v3155_v16  ;;  %v3161_v20 = vld [vmem:[%s4805_s1 + $0x30] ss:$24 sps:$4 sm:$0xff]   ;;  %v3163_v22 = vld [vmem:[%s4805_s1 + $0x64] ss:$24 sps:$4 sm:$0xff]   ;;  %v3167_v24 = vld [vmem:[%s4805_s1 + $0x60] ss:$24 sps:$4 sm:$0xff]  }
   0x5   :  { %1872 = vmatpush1.bf16.msra.mxu0 %v3156_v17  ;;  %1832 = vmatprep.subr.bf16.mxu1 %v3157_v18  ;;  %v3162_v21 = vld [vmem:[%s4805_s1 + $0x330] ss:$24 sps:$4 sm:$0xff]   ;;  %v3165_v23 = vld [vmem:[%s4805_s1 + $0x364] ss:$24 sps:$4 sm:$0xff]   ;;  %v3168_v25 = vld [vmem:[%s4805_s1 + $0x360] ss:$24 sps:$4 sm:$0xff]  }
   0x6   :  { %v28_v9 = vadd.f32 %v27_v7, %v23_v4  ;;  %1873 = vmatprep.subr.bf16.mxu0 %v3159_v19  ;;  %v3169_v26 = vld [vmem:[%s4805_s1 + $0x94] ss:$24 sps:$4 sm:$0xff]   ;;  %v3173_v28 = vld [vmem:[%s4805_s1 + $0x90] ss:$24 sps:$4 sm:$0xff]   ;;  %v3175_v30 = vld [vmem:[%s4805_s1 + $0xc4] ss:$24 sps:$4 sm:$0xff]  }
   0x7   :  { %v3171_v27 = vld [vmem:[%s4805_s1 + $0x394] ss:$24 sps:$4 sm:$0xff]   ;;  %v3174_v29 = vld [vmem:[%s4805_s1 + $0x390] ss:$24 sps:$4 sm:$0xff]   ;;  %v3177_v31 = vld [vmem:[%s4805_s1 + $0x3c4] ss:$24 sps:$4 sm:$0xff]  }
   0x8   :  { %v29_v11 = vadd.f32 %v28_v9, %v24_v6  ;;  %1833 = vmatpush1.bf16.msra.mxu1 %v3161_v20  ;;  %v3179_v32 = vld [vmem:[%s4805_s1 + $0xc0] ss:$24 sps:$4 sm:$0xff]   ;;  %v3181_v34 = vld [vmem:[%s4805_s1 + $0xf4] ss:$24 sps:$4 sm:$0xff]   ;;  %v3185_v36 = vld [vmem:[%s4805_s1 + $0xf0] ss:$24 sps:$4 sm:$0xff]  }
   0x9   :  { %1874 = vmatpush1.bf16.msra.mxu0 %v3162_v21  ;;  %1834 = vmatprep.subr.bf16.mxu1 %v3163_v22  ;;  %v3180_v33 = vld [vmem:[%s4805_s1 + $0x3c0] ss:$24 sps:$4 sm:$0xff]   ;;  %v3183_v35 = vld [vmem:[%s4805_s1 + $0x3f4] ss:$24 sps:$4 sm:$0xff]   ;;  %v3186_v37 = vld [vmem:[%s4805_s1 + $0x3f0] ss:$24 sps:$4 sm:$0xff]  }
   0xa   :  { %v30_v12 = vadd.f32 %v29_v11, %v25_v8  ;;  %1875 = vmatprep.subr.bf16.mxu0 %v3165_v23  ;;  %v3187_v38 = vld [vmem:[%s4805_s1 + $0x124] ss:$24 sps:$4 sm:$0xff]   ;;  %v3191_v40 = vld [vmem:[%s4805_s1 + $0x120] ss:$24 sps:$4 sm:$0xff]   ;;  %v3193_v42 = vld [vmem:[%s4805_s1 + $0x154] ss:$24 sps:$4 sm:$0xff]  }
   0xb   :  { %v3189_v39 = vld [vmem:[%s4805_s1 + $0x424] ss:$24 sps:$4 sm:$0xff]   ;;  %v3192_v41 = vld [vmem:[%s4805_s1 + $0x420] ss:$24 sps:$4 sm:$0xff]   ;;  %v3195_v43 = vld [vmem:[%s4805_s1 + $0x454] ss:$24 sps:$4 sm:$0xff]  }
   0xc   :  { %v31_v13 = vadd.f32 %v30_v12, %v26_v10  ;;  %1835 = vmatpush1.bf16.msra.mxu1 %v3167_v24  ;;  %v3197_v44 = vld [vmem:[%s4805_s1 + $0x150] ss:$24 sps:$4 sm:$0xff]   ;;  %v3199_v46 = vld [vmem:[%s4805_s1 + $0x184] ss:$24 sps:$4 sm:$0xff]   ;;  %v3203_v48 = vld [vmem:[%s4805_s1 + $0x180] ss:$24 sps:$4 sm:$0xff]  }
   0xd   :  { %1876 = vmatpush1.bf16.msra.mxu0 %v3168_v25  ;;  %1836 = vmatprep.subr.bf16.mxu1 %v3169_v26  ;;  %v3198_v45 = vld [vmem:[%s4805_s1 + $0x450] ss:$24 sps:$4 sm:$0xff]   ;;  %v3201_v47 = vld [vmem:[%s4805_s1 + $0x484] ss:$24 sps:$4 sm:$0xff]   ;;  %v3204_v49 = vld [vmem:[%s4805_s1 + $0x480] ss:$24 sps:$4 sm:$0xff]  }
   0xe   :  { %32 = vadd.xlane.f32.xlu0 %v31_v13  ;;  %1877 = vmatprep.subr.bf16.mxu0 %v3171_v27  ;;  %v3205_v50 = vld [vmem:[%s4805_s1 + $0x1b4] ss:$24 sps:$4 sm:$0xff]   ;;  %v3209_v52 = vld [vmem:[%s4805_s1 + $0x1b0] ss:$24 sps:$4 sm:$0xff]   ;;  %v3211_v54 = vld [vmem:[%s4805_s1 + $0x1e4] ss:$24 sps:$4 sm:$0xff]  }
   0xf   :  { %v3207_v51 = vld [vmem:[%s4805_s1 + $0x4b4] ss:$24 sps:$4 sm:$0xff]   ;;  %v3210_v53 = vld [vmem:[%s4805_s1 + $0x4b0] ss:$24 sps:$4 sm:$0xff]   ;;  %v3213_v55 = vld [vmem:[%s4805_s1 + $0x4e4] ss:$24 sps:$4 sm:$0xff]  }
  0x10   :  { %1837 = vmatpush1.bf16.msra.mxu1 %v3173_v28  ;;  %v3215_v56 = vld [vmem:[%s4805_s1 + $0x1e0] ss:$24 sps:$4 sm:$0xff]   ;;  %v3217_v58 = vld [vmem:[%s4805_s1 + $0x214] ss:$24 sps:$4 sm:$0xff]   ;;  %v3222_v18 = vld [vmem:[%s4805_s1 + $0x510] ss:$24 sps:$4 sm:$0xff]  }
  0x11   :  { %1878 = vmatpush1.bf16.msra.mxu0 %v3174_v29  ;;  %1838 = vmatprep.subr.bf16.mxu1 %v3175_v30  ;;  %v3216_v57 = vld [vmem:[%s4805_s1 + $0x4e0] ss:$24 sps:$4 sm:$0xff]   ;;  %v3219_v59 = vld [vmem:[%s4805_s1 + $0x514] ss:$24 sps:$4 sm:$0xff]   ;;  %v3223_v5 = vld [vmem:[%s4805_s1 + $0x244] ss:$24 sps:$4 sm:$0xff]  }
  0x12   :  { %1879 = vmatprep.subr.bf16.mxu0 %v3177_v31  ;;  %v3227_v19 = vld [vmem:[%s4805_s1 + $0x240] ss:$24 sps:$4 sm:$0xff]   ;;  %v3229_v21 = vld [vmem:[%s4805_s1 + $0x274] ss:$24 sps:$4 sm:$0xff]   ;;  %v3233_v23 = vld [vmem:[%s4805_s1 + $0x270] ss:$24 sps:$4 sm:$0xff]  }
  0x13   :  { %v3228_v20 = vld [vmem:[%s4805_s1 + $0x540] ss:$24 sps:$4 sm:$0xff]   ;;  %v3231_v22 = vld [vmem:[%s4805_s1 + $0x574] ss:$24 sps:$4 sm:$0xff]   ;;  %v3234_v24 = vld [vmem:[%s4805_s1 + $0x570] ss:$24 sps:$4 sm:$0xff]  }
  0x14   :  { %1839 = vmatpush1.bf16.msra.mxu1 %v3179_v32  ;;  %v3235_v25 = vld [vmem:[%s4805_s1 + $0x2a4] ss:$24 sps:$4 sm:$0xff]   ;;  %v3239_v27 = vld [vmem:[%s4805_s1 + $0x2a0] ss:$24 sps:$4 sm:$0xff]   ;;  %v3241_v29 = vld [vmem:[%s4805_s1 + $0x2d4] ss:$24 sps:$4 sm:$0xff]  }
  0x15   :  { %1880 = vmatpush1.bf16.msra.mxu0 %v3180_v33  ;;  %1840 = vmatprep.subr.bf16.mxu1 %v3181_v34  ;;  %v3237_v26 = vld [vmem:[%s4805_s1 + $0x5a4] ss:$24 sps:$4 sm:$0xff]   ;;  %v3240_v28 = vld [vmem:[%s4805_s1 + $0x5a0] ss:$24 sps:$4 sm:$0xff]   ;;  %v3243_v30 = vld [vmem:[%s4805_s1 + $0x5d4] ss:$24 sps:$4 sm:$0xff]  }
  0x16   :  { %1881 = vmatprep.subr.bf16.mxu0 %v3183_v35  ;;  %v3245_v31 = vld [vmem:[%s4805_s1 + $0x2d0] ss:$24 sps:$4 sm:$0xff]   ;;  %v3249_v33 = vld [vmem:[%s4805_s1 + $0x604] ss:$24 sps:$4 sm:$0xff]  }
  0x17   :  { %v3246_v32 = vld [vmem:[%s4805_s1 + $0x5d0] ss:$24 sps:$4 sm:$0xff]   ;;  %v3252_v34 = vld [vmem:[%s4805_s1 + $0xc] ss:$24 sps:$4 sm:$0xff]  }
  0x18   :  { %1841 = vmatpush1.bf16.msra.mxu1 %v3185_v36 }
  0x19   :  { %1882 = vmatpush1.bf16.msra.mxu0 %v3186_v37  ;;  %1842 = vmatprep.subr.bf16.mxu1 %v3187_v38 }
  0x1a   :  { %1883 = vmatprep.subr.bf16.mxu0 %v3189_v39 }
  0x1c   :  { %1843 = vmatpush1.bf16.msra.mxu1 %v3191_v40 }
  0x1d   :  { %1884 = vmatpush1.bf16.msra.mxu0 %v3192_v41  ;;  %1844 = vmatprep.subr.bf16.mxu1 %v3193_v42 }
  0x1e   :  { %1885 = vmatprep.subr.bf16.mxu0 %v3195_v43 }
  0x20   :  { %1845 = vmatpush1.bf16.msra.mxu1 %v3197_v44 }
  0x21   :  { %1886 = vmatpush1.bf16.msra.mxu0 %v3198_v45  ;;  %1846 = vmatprep.subr.bf16.mxu1 %v3199_v46  ;;  %v3247_v46 = vld [vmem:[%s4805_s1 + $0x600] ss:$24 sps:$4 sm:$0xff]  }
  0x22   :  { %1887 = vmatprep.subr.bf16.mxu0 %v3201_v47  ;;  %v3250_v47 = vld [vmem:[%s4805_s1 + $0x8] ss:$24 sps:$4 sm:$0xff]  }
  0x24   :  { %1847 = vmatpush1.bf16.msra.mxu1 %v3203_v48 }
  0x25   :  { %1888 = vmatpush1.bf16.msra.mxu0 %v3204_v49  ;;  %1848 = vmatprep.subr.bf16.mxu1 %v3205_v50  ;;  %v3255_v50 = vld [vmem:[%s4805_s1 + $0x634] ss:$24 sps:$4 sm:$0xff]  }
  0x26   :  { %1889 = vmatprep.subr.bf16.mxu0 %v3207_v51  ;;  %v3258_v51 = vld [vmem:[%s4805_s1 + $0x3c] ss:$24 sps:$4 sm:$0xff]  }
  0x28   :  { %1849 = vmatpush1.bf16.msra.mxu1 %v3209_v52 }
  0x29   :  { %1890 = vmatpush1.bf16.msra.mxu0 %v3210_v53  ;;  %1850 = vmatprep.subr.bf16.mxu1 %v3211_v54  ;;  %v3253_v53 = vld [vmem:[%s4805_s1 + $0x630] ss:$24 sps:$4 sm:$0xff]  }
  0x2a   :  { %1891 = vmatprep.subr.bf16.mxu0 %v3213_v55  ;;  %v3256_v54 = vld [vmem:[%s4805_s1 + $0x38] ss:$24 sps:$4 sm:$0xff]   ;;  %v3261_v55 = vld [vmem:[%s4805_s1 + $0x664] ss:$24 sps:$4 sm:$0xff]  }
  0x2c   :  { %1851 = vmatpush1.bf16.msra.mxu1 %v3215_v56  ;;  %v3264_v56 = vld [vmem:[%s4805_s1 + $0x6c] ss:$24 sps:$4 sm:$0xff]  }
  0x2d   :  { %1892 = vmatpush1.bf16.msra.mxu0 %v3216_v57  ;;  %1852 = vmatprep.subr.bf16.mxu1 %v3217_v58  ;;  %v3259_v57 = vld [vmem:[%s4805_s1 + $0x660] ss:$24 sps:$4 sm:$0xff]  }
  0x2e   :  { %1893 = vmatprep.subr.bf16.mxu0 %v3219_v59  ;;  %v3262_v58 = vld [vmem:[%s4805_s1 + $0x68] ss:$24 sps:$4 sm:$0xff]   ;;  %v3267_v59 = vld [vmem:[%s4805_s1 + $0x694] ss:$24 sps:$4 sm:$0xff]  }
  0x31   :  { %1894 = vmatpush1.bf16.msra.mxu0 %v3222_v18  ;;  %v3297_v18 = vld [vmem:[%s4805_s1 + $0x784] ss:$24 sps:$4 sm:$0xff]  }
  0x9b   :  { %v33_v60 = vpop.xlane.xlu0 %32 }
  0x9c   :  { %v35_v61 = vmul.f32 0.0013020834, %v33_v60  ;;  %v3270_v60 = vld [vmem:[%s4805_s1 + $0x9c] ss:$24 sps:$4 sm:$0xff]  }
  0x9e   :  { %v3843_v62 = vsub.f32 %v21_v2, %v35_v61  ;;  %v37_v63 = vsub.f32 %v22_v3, %v35_v61  ;;  %v3849_v7 = vsub.f32 %v23_v4, %v35_v61  ;;  %v39_v9 = vsub.f32 %v24_v6, %v35_v61 }
  0x9f   :  { %v3857_v13 = vsub.f32 %v25_v8, %v35_v61  ;;  %v41_v3 = vsub.f32 %v26_v10, %v35_v61  ;;  %v3221_v8 = vld [vmem:[%s4805_s1 + $0x210] ss:$24 sps:$4 sm:$0xff]   ;;  %v3225_v10 = vld [vmem:[%s4805_s1 + $0x544] ss:$24 sps:$4 sm:$0xff]  }
  0xa0   :  { %v42_v11 = vmul.f32 %v3843_v62, %v3843_v62  ;;  %v43_v12 = vmul.f32 %v37_v63, %v37_v63  ;;  %v44_v2 = vmul.f32 %v3849_v7, %v3849_v7  ;;  %v45_v4 = vmul.f32 %v39_v9, %v39_v9  ;;  %1853 = vmatpush1.bf16.msra.mxu1 %v3221_v8  ;;  %v3265_v61 = vld [vmem:[%s4805_s1 + $0x690] ss:$24 sps:$4 sm:$0xff]  }
  0xa1   :  { %v46_v1 = vmul.f32 %v3857_v13, %v3857_v13  ;;  %v47_v15 = vmul.f32 %v41_v3, %v41_v3  ;;  %1854 = vmatprep.subr.bf16.mxu1 %v3223_v5  ;;  %1895 = vmatprep.subr.bf16.mxu0 %v3225_v10  ;;  %v3292_v8 = vld [vmem:[%s4805_s1 + $0x158] ss:$24 sps:$4 sm:$0xff]   ;;  %v3300_v5 = vld [vmem:[%s4805_s1 + $0x18c] ss:$24 sps:$4 sm:$0xff]  }
  0xa2   :  { %v48_v0 = vadd.f32 %v43_v12, %v42_v11  ;;  %1896 = vmatpush1.bf16.msra.mxu0 %v3228_v20  ;;  %v3274_v11 = vld [vmem:[%s4805_s1 + $0xc8] ss:$24 sps:$4 sm:$0xff]   ;;  %v3279_v12 = vld [vmem:[%s4805_s1 + $0x6f4] ss:$24 sps:$4 sm:$0xff]  }
  0xa3   :  { %1897 = vmatprep.subr.bf16.mxu0 %v3231_v22  ;;  %v3295_v10 = vld [vmem:[%s4805_s1 + $0x780] ss:$24 sps:$4 sm:$0xff]   ;;  %v3303_v20 = vld [vmem:[%s4805_s1 + $0x7b4] ss:$24 sps:$4 sm:$0xff]   ;;  %v3301_v22 = vld [vmem:[%s4805_s1 + $0x7b0] ss:$24 sps:$4 sm:$0xff]  }
  0xa4   :  { %v49_v14 = vadd.f32 %v48_v0, %v44_v2  ;;  %1855 = vmatpush1.bf16.msra.mxu1 %v3227_v19  ;;  %v3282_v2 = vld [vmem:[%s4805_s1 + $0xfc] ss:$24 sps:$4 sm:$0xff]   ;;  %v3277_v0 = vld [vmem:[%s4805_s1 + $0x6f0] ss:$24 sps:$4 sm:$0xff]  }
  0xa5   :  { %1856 = vmatprep.subr.bf16.mxu1 %v3229_v21  ;;  %v3298_v19 = vld [vmem:[%s4805_s1 + $0x188] ss:$24 sps:$4 sm:$0xff]   ;;  %v3306_v21 = vld [vmem:[%s4805_s1 + $0x1bc] ss:$24 sps:$4 sm:$0xff]  }
  0xa6   :  { %v50_v6 = vadd.f32 %v49_v14, %v45_v4  ;;  %1898 = vmatpush1.bf16.msra.mxu0 %v3234_v24  ;;  %v3285_v4 = vld [vmem:[%s4805_s1 + $0x724] ss:$24 sps:$4 sm:$0xff]  }
  0xa7   :  { %1899 = vmatprep.subr.bf16.mxu0 %v3237_v26  ;;  %v3288_v14 = vld [vmem:[%s4805_s1 + $0x12c] ss:$24 sps:$4 sm:$0xff]   ;;  %v3307_v26 = vld [vmem:[%s4805_s1 + $0x7e0] ss:$24 sps:$4 sm:$0xff]  }
  0xa8   :  { %v51_v16 = vadd.f32 %v50_v6, %v46_v1  ;;  %1857 = vmatpush1.bf16.msra.mxu1 %v3233_v23  ;;  %v3283_v1 = vld [vmem:[%s4805_s1 + $0x720] ss:$24 sps:$4 sm:$0xff]   ;;  %v3309_v24 = vld [vmem:[%s4805_s1 + $0x7e4] ss:$24 sps:$4 sm:$0xff]  }
  0xa9   :  { %1858 = vmatprep.subr.bf16.mxu1 %v3235_v25  ;;  %v3286_v6 = vld [vmem:[%s4805_s1 + $0x128] ss:$24 sps:$4 sm:$0xff]   ;;  %v3304_v23 = vld [vmem:[%s4805_s1 + $0x1b8] ss:$24 sps:$4 sm:$0xff]   ;;  %v3312_v25 = vld [vmem:[%s4805_s1 + $0x1ec] ss:$24 sps:$4 sm:$0xff]  }
  0xaa   :  { %v52_v17 = vadd.f32 %v51_v16, %v47_v15  ;;  %1900 = vmatpush1.bf16.msra.mxu0 %v3240_v28  ;;  %v3291_v15 = vld [vmem:[%s4805_s1 + $0x754] ss:$24 sps:$4 sm:$0xff]  }
  0xab   :  { %1901 = vmatprep.subr.bf16.mxu0 %v3243_v30  ;;  %v3294_v16 = vld [vmem:[%s4805_s1 + $0x15c] ss:$24 sps:$4 sm:$0xff]   ;;  %v3313_v30 = vld [vmem:[%s4805_s1 + $0x810] ss:$24 sps:$4 sm:$0xff]  }
  0xac   :  { %53 = vadd.xlane.f32.xlu0 %v52_v17  ;;  %1859 = vmatpush1.bf16.msra.mxu1 %v3239_v27  ;;  %v3289_v17 = vld [vmem:[%s4805_s1 + $0x750] ss:$24 sps:$4 sm:$0xff]   ;;  %v3315_v28 = vld [vmem:[%s4805_s1 + $0x814] ss:$24 sps:$4 sm:$0xff]  }
  0xad   :  { %1860 = vmatprep.subr.bf16.mxu1 %v3241_v29  ;;  %v3310_v27 = vld [vmem:[%s4805_s1 + $0x1e8] ss:$24 sps:$4 sm:$0xff]   ;;  %v3318_v29 = vld [vmem:[%s4805_s1 + $0x21c] ss:$24 sps:$4 sm:$0xff]  }
  0xae   :  { %1902 = vmatpush1.bf16.msra.mxu0 %v3246_v32  ;;  %v3321_v32 = vld [vmem:[%s4805_s1 + $0x844] ss:$24 sps:$4 sm:$0xff]  }
  0xaf   :  { %1912 = vmatprep.subr.bf16.mxu0 %v3249_v33  ;;  %v3324_v33 = vld [vmem:[%s4805_s1 + $0x24c] ss:$24 sps:$4 sm:$0xff]  }
  0xb0   :  { %1861 = vmatpush1.bf16.msra.mxu1 %v3245_v31  ;;  %v3316_v31 = vld [vmem:[%s4805_s1 + $0x218] ss:$24 sps:$4 sm:$0xff]  }
  0xb1   :  { %1953 = vmatprep.subr.bf16.mxu1 %v3252_v34  ;;  %v3319_v34 = vld [vmem:[%s4805_s1 + $0x840] ss:$24 sps:$4 sm:$0xff]  }
 0x139   :  { %v54_v35 = vpop.xlane.xlu0 %53 }
 0x13a   :  { %v55_v36 = vmul.f32 0.0013020834, %v54_v35  ;;  %v3322_v35 = vld [vmem:[%s4805_s1 + $0x248] ss:$24 sps:$4 sm:$0xff]  }
 0x13c   :  { %v56_v37 = vadd.f32 1e-05, %v55_v36  ;;  %v3327_v36 = vld [vmem:[%s4805_s1 + $0x874] ss:$24 sps:$4 sm:$0xff]  }
 0x13e   :  { %3631 = vrsqrt.f32 %v56_v37  ;;  %v3330_v37 = vld [vmem:[%s4805_s1 + $0x27c] ss:$24 sps:$4 sm:$0xff]  }
 0x148   :  { %v3925_v38 = vpop.eup %3631 }
 0x149   :  { %v59_v39 = vmul.f32 %v3925_v38, %v37_v63  ;;  %v61_v40 = vmul.f32 %v3925_v38, %v39_v9  ;;  %v58_v41 = vmul.f32 %v3925_v38, %v3843_v62  ;;  %v60_v42 = vmul.f32 %v3925_v38, %v3849_v7  ;;  %v3268_v62 = vld [vmem:[%s4805_s1 + $0x98] ss:$24 sps:$4 sm:$0xff]   ;;  %v3273_v63 = vld [vmem:[%s4805_s1 + $0x6c4] ss:$24 sps:$4 sm:$0xff]  }
 0x14a   :  { %v63_v43 = vmul.f32 %v3925_v38, %v41_v3  ;;  %v3276_v7 = vld [vmem:[%s4805_s1 + $0xcc] ss:$24 sps:$4 sm:$0xff]   ;;  %v3271_v9 = vld [vmem:[%s4805_s1 + $0x6c0] ss:$24 sps:$4 sm:$0xff]  }
 0x14b   :  { %v3934_v44 = vpack.c.bf16 %v59_v39, %v59_v39  ;;  %v3936_v45 = vpack.c.bf16 %v61_v40, %v61_v40  ;;  %v3944_v48 = vpack.c.bf16 %v58_v41, %v58_v41  ;;  %v3946_v49 = vpack.c.bf16 %v60_v42, %v60_v42  ;;  %v3280_v3 = vld [vmem:[%s4805_s1 + $0xf8] ss:$24 sps:$4 sm:$0xff]   ;;  %v3333_v41 = vld [vmem:[%s4805_s1 + $0x8a4] ss:$24 sps:$4 sm:$0xff]  }
 0x14c   :  { %v3958_v52 = vpack.c.bf16 %v63_v43, %v63_v43  ;;  %v3325_v39 = vld [vmem:[%s4805_s1 + $0x870] ss:$24 sps:$4 sm:$0xff]   ;;  %v3336_v42 = vld [vmem:[%s4805_s1 + $0x2ac] ss:$24 sps:$4 sm:$0xff]   ;;  %v3331_v43 = vld [vmem:[%s4805_s1 + $0x8a0] ss:$24 sps:$4 sm:$0xff]  }
 0x14d   :  { %1862 = vmatprep.mubr.bf16.mxu1 %v3934_v44  ;;  %1903 = vmatprep.mubr.bf16.mxu0 %v3936_v45  ;;  %v3328_v40 = vld [vmem:[%s4805_s1 + $0x278] ss:$24 sps:$4 sm:$0xff]  }
 0x14e   :  { %1863 = vmatmul.mubr.bf16.vlgmr.msra.gmra.mrb[0].mxu1 %v3944_v48  ;;  %1904 = vmatmul.mubr.bf16.vlgmr.msra.gmra.mrb[0].mxu0 %v3946_v49 }
 0x14f   :  { %1913 = vmatpush1.bf16.msra.mxu0 %v3247_v46  ;;  %1954 = vmatpush1.bf16.msra.mxu1 %v3250_v47  ;;  %v3334_v46 = vld [vmem:[%s4805_s1 + $0x2a8] ss:$24 sps:$4 sm:$0xff]   ;;  %v3339_v47 = vld [vmem:[%s4805_s1 + $0x8d4] ss:$24 sps:$4 sm:$0xff]  }
 0x150   :  { %1944 = vmatprep.mubr.bf16.mxu0 %v3958_v52  ;;  %1985 = vmatprep.mubr.bf16.mxu1 %v3934_v44 }
 0x151   :  { %1914 = vmatprep.subr.bf16.mxu0 %v3255_v50  ;;  %1955 = vmatprep.subr.bf16.mxu1 %v3258_v51  ;;  %v3342_v50 = vld [vmem:[%s4805_s1 + $0x2dc] ss:$24 sps:$4 sm:$0xff]   ;;  %v3337_v51 = vld [vmem:[%s4805_s1 + $0x8d0] ss:$24 sps:$4 sm:$0xff]  }
 0x153   :  { %1915 = vmatpush1.bf16.msra.mxu0 %v3253_v53  ;;  %1956 = vmatpush1.bf16.msra.mxu1 %v3256_v54  ;;  %v3340_v53 = vld [vmem:[%s4805_s1 + $0x2d8] ss:$24 sps:$4 sm:$0xff]   ;;  %v62_v54 = vmul.f32 %v3925_v38, %v3857_v13  ;;  %v3351_v38 = vld [vmem:[%s4805_s1 + $0x33c] ss:$24 sps:$4 sm:$0xff]  }
 0x154   :  { %1916 = vmatprep.subr.bf16.mxu0 %v3261_v55  ;;  %1957 = vmatprep.subr.bf16.mxu1 %v3264_v56  ;;  %v3345_v55 = vld [vmem:[%s4805_s1 + $0x30c] ss:$24 sps:$4 sm:$0xff]   ;;  %v3346_v13 = vld [vmem:[%s4805_s1 + $0x10] ss:$24 sps:$4 sm:$0xff]  }
 0x155   :  { %v3348_v56 = vld [vmem:[%s4805_s1 + $0x14] ss:$24 sps:$4 sm:$0xff]  }
 0x157   :  { %1917 = vmatpush1.bf16.msra.mxu0 %v3259_v57  ;;  %1958 = vmatpush1.bf16.msra.mxu1 %v3262_v58  ;;  %v3343_v57 = vld [vmem:[%s4805_s1 + $0x308] ss:$24 sps:$4 sm:$0xff]   ;;  %v4147_v58 = vpack.c.bf16 %v62_v54, %v62_v54 }
 0x158   :  { %1918 = vmatprep.subr.bf16.mxu0 %v3267_v59  ;;  %1959 = vmatprep.subr.bf16.mxu1 %v3270_v60  ;;  %v3354_v59 = vld [vmem:[%s4805_s1 + $0x44] ss:$24 sps:$4 sm:$0xff]   ;;  %v3349_v60 = vld [vmem:[%s4805_s1 + $0x338] ss:$24 sps:$4 sm:$0xff]   ;;  %v3427_v54 = vld [vmem:[%s4805_s1 + $0x5a8] ss:$24 sps:$4 sm:$0xff]  }
 0x15b   :  { %1919 = vmatpush1.bf16.msra.mxu0 %v3265_v61  ;;  %1960 = vmatpush1.bf16.msra.mxu1 %v3268_v62  ;;  %v3352_v61 = vld [vmem:[%s4805_s1 + $0x40] ss:$24 sps:$4 sm:$0xff]   ;;  %v3357_v62 = vld [vmem:[%s4805_s1 + $0x36c] ss:$24 sps:$4 sm:$0xff]  }
 0x15c   :  { %1920 = vmatprep.subr.bf16.mxu0 %v3273_v63  ;;  %1961 = vmatprep.subr.bf16.mxu1 %v3276_v7  ;;  %v3360_v63 = vld [vmem:[%s4805_s1 + $0x74] ss:$24 sps:$4 sm:$0xff]   ;;  %v3355_v7 = vld [vmem:[%s4805_s1 + $0x368] ss:$24 sps:$4 sm:$0xff]  }
 0x15f   :  { %1921 = vmatpush1.bf16.msra.mxu0 %v3271_v9  ;;  %1962 = vmatpush1.bf16.msra.mxu1 %v3274_v11  ;;  %v3363_v9 = vld [vmem:[%s4805_s1 + $0x39c] ss:$24 sps:$4 sm:$0xff]  }
 0x160   :  { %1922 = vmatprep.subr.bf16.mxu0 %v3279_v12  ;;  %1963 = vmatprep.subr.bf16.mxu1 %v3282_v2  ;;  %v3366_v11 = vld [vmem:[%s4805_s1 + $0xa4] ss:$24 sps:$4 sm:$0xff]   ;;  %v3361_v12 = vld [vmem:[%s4805_s1 + $0x398] ss:$24 sps:$4 sm:$0xff]  }
 0x161   :  { %v3364_v2 = vld [vmem:[%s4805_s1 + $0xa0] ss:$24 sps:$4 sm:$0xff]  }
 0x163   :  { %1923 = vmatpush1.bf16.msra.mxu0 %v3277_v0  ;;  %1964 = vmatpush1.bf16.msra.mxu1 %v3280_v3  ;;  %v3369_v0 = vld [vmem:[%s4805_s1 + $0x3cc] ss:$24 sps:$4 sm:$0xff]  }
 0x164   :  { %1924 = vmatprep.subr.bf16.mxu0 %v3285_v4  ;;  %1965 = vmatprep.subr.bf16.mxu1 %v3288_v14  ;;  %v3372_v3 = vld [vmem:[%s4805_s1 + $0xd4] ss:$24 sps:$4 sm:$0xff]   ;;  %v3367_v4 = vld [vmem:[%s4805_s1 + $0x3c8] ss:$24 sps:$4 sm:$0xff]  }
 0x165   :  { %v3370_v14 = vld [vmem:[%s4805_s1 + $0xd0] ss:$24 sps:$4 sm:$0xff]  }
 0x167   :  { %1925 = vmatpush1.bf16.msra.mxu0 %v3283_v1  ;;  %1966 = vmatpush1.bf16.msra.mxu1 %v3286_v6  ;;  %v3375_v1 = vld [vmem:[%s4805_s1 + $0x3fc] ss:$24 sps:$4 sm:$0xff]  }
 0x168   :  { %1926 = vmatprep.subr.bf16.mxu0 %v3291_v15  ;;  %1967 = vmatprep.subr.bf16.mxu1 %v3294_v16  ;;  %v3378_v6 = vld [vmem:[%s4805_s1 + $0x104] ss:$24 sps:$4 sm:$0xff]   ;;  %v3373_v15 = vld [vmem:[%s4805_s1 + $0x3f8] ss:$24 sps:$4 sm:$0xff]  }
 0x169   :  { %v3376_v16 = vld [vmem:[%s4805_s1 + $0x100] ss:$24 sps:$4 sm:$0xff]  }
 0x16b   :  { %1927 = vmatpush1.bf16.msra.mxu0 %v3289_v17  ;;  %1968 = vmatpush1.bf16.msra.mxu1 %v3292_v8  ;;  %v3381_v17 = vld [vmem:[%s4805_s1 + $0x42c] ss:$24 sps:$4 sm:$0xff]  }
 0x16c   :  { %1928 = vmatprep.subr.bf16.mxu0 %v3297_v18  ;;  %1969 = vmatprep.subr.bf16.mxu1 %v3300_v5  ;;  %v3384_v8 = vld [vmem:[%s4805_s1 + $0x134] ss:$24 sps:$4 sm:$0xff]   ;;  %v3379_v18 = vld [vmem:[%s4805_s1 + $0x428] ss:$24 sps:$4 sm:$0xff]  }
 0x16d   :  { %v3382_v5 = vld [vmem:[%s4805_s1 + $0x130] ss:$24 sps:$4 sm:$0xff]  }
 0x16f   :  { %1929 = vmatpush1.bf16.msra.mxu0 %v3295_v10  ;;  %1970 = vmatpush1.bf16.msra.mxu1 %v3298_v19  ;;  %v3387_v10 = vld [vmem:[%s4805_s1 + $0x45c] ss:$24 sps:$4 sm:$0xff]  }
 0x170   :  { %1930 = vmatprep.subr.bf16.mxu0 %v3303_v20  ;;  %1971 = vmatprep.subr.bf16.mxu1 %v3306_v21  ;;  %v3390_v19 = vld [vmem:[%s4805_s1 + $0x164] ss:$24 sps:$4 sm:$0xff]   ;;  %v3385_v20 = vld [vmem:[%s4805_s1 + $0x458] ss:$24 sps:$4 sm:$0xff]  }
 0x171   :  { %v3388_v21 = vld [vmem:[%s4805_s1 + $0x160] ss:$24 sps:$4 sm:$0xff]  }
 0x173   :  { %1931 = vmatpush1.bf16.msra.mxu0 %v3301_v22  ;;  %1972 = vmatpush1.bf16.msra.mxu1 %v3304_v23  ;;  %v3393_v22 = vld [vmem:[%s4805_s1 + $0x48c] ss:$24 sps:$4 sm:$0xff]  }
 0x174   :  { %1932 = vmatprep.subr.bf16.mxu0 %v3309_v24  ;;  %1973 = vmatprep.subr.bf16.mxu1 %v3312_v25  ;;  %v3396_v23 = vld [vmem:[%s4805_s1 + $0x194] ss:$24 sps:$4 sm:$0xff]   ;;  %v3391_v24 = vld [vmem:[%s4805_s1 + $0x488] ss:$24 sps:$4 sm:$0xff]  }
 0x175   :  { %v3394_v25 = vld [vmem:[%s4805_s1 + $0x190] ss:$24 sps:$4 sm:$0xff]  }
 0x177   :  { %1933 = vmatpush1.bf16.msra.mxu0 %v3307_v26  ;;  %1974 = vmatpush1.bf16.msra.mxu1 %v3310_v27  ;;  %v3399_v26 = vld [vmem:[%s4805_s1 + $0x4bc] ss:$24 sps:$4 sm:$0xff]  }
 0x178   :  { %1934 = vmatprep.subr.bf16.mxu0 %v3315_v28  ;;  %1975 = vmatprep.subr.bf16.mxu1 %v3318_v29  ;;  %v3402_v27 = vld [vmem:[%s4805_s1 + $0x1c4] ss:$24 sps:$4 sm:$0xff]   ;;  %v3397_v28 = vld [vmem:[%s4805_s1 + $0x4b8] ss:$24 sps:$4 sm:$0xff]  }
 0x179   :  { %v3400_v29 = vld [vmem:[%s4805_s1 + $0x1c0] ss:$24 sps:$4 sm:$0xff]  }
 0x17b   :  { %1935 = vmatpush1.bf16.msra.mxu0 %v3313_v30  ;;  %1976 = vmatpush1.bf16.msra.mxu1 %v3316_v31  ;;  %v3405_v30 = vld [vmem:[%s4805_s1 + $0x4ec] ss:$24 sps:$4 sm:$0xff]  }
 0x17c   :  { %1936 = vmatprep.subr.bf16.mxu0 %v3321_v32  ;;  %1977 = vmatprep.subr.bf16.mxu1 %v3324_v33  ;;  %v3408_v31 = vld [vmem:[%s4805_s1 + $0x1f4] ss:$24 sps:$4 sm:$0xff]   ;;  %v3403_v32 = vld [vmem:[%s4805_s1 + $0x4e8] ss:$24 sps:$4 sm:$0xff]  }
 0x17d   :  { %v3406_v33 = vld [vmem:[%s4805_s1 + $0x1f0] ss:$24 sps:$4 sm:$0xff]  }
 0x17f   :  { %1937 = vmatpush1.bf16.msra.mxu0 %v3319_v34  ;;  %1978 = vmatpush1.bf16.msra.mxu1 %v3322_v35  ;;  %v3411_v34 = vld [vmem:[%s4805_s1 + $0x51c] ss:$24 sps:$4 sm:$0xff]  }
 0x180   :  { %1938 = vmatprep.subr.bf16.mxu0 %v3327_v36  ;;  %1979 = vmatprep.subr.bf16.mxu1 %v3330_v37  ;;  %v3414_v35 = vld [vmem:[%s4805_s1 + $0x224] ss:$24 sps:$4 sm:$0xff]   ;;  %v3409_v36 = vld [vmem:[%s4805_s1 + $0x518] ss:$24 sps:$4 sm:$0xff]  }
 0x181   :  { %v3412_v37 = vld [vmem:[%s4805_s1 + $0x220] ss:$24 sps:$4 sm:$0xff]  }
 0x183   :  { %1939 = vmatpush1.bf16.msra.mxu0 %v3325_v39  ;;  %1980 = vmatpush1.bf16.msra.mxu1 %v3328_v40  ;;  %v3417_v39 = vld [vmem:[%s4805_s1 + $0x54c] ss:$24 sps:$4 sm:$0xff]  }
 0x184   :  { %1940 = vmatprep.subr.bf16.mxu0 %v3333_v41  ;;  %1981 = vmatprep.subr.bf16.mxu1 %v3336_v42  ;;  %v3420_v40 = vld [vmem:[%s4805_s1 + $0x254] ss:$24 sps:$4 sm:$0xff]   ;;  %v3415_v41 = vld [vmem:[%s4805_s1 + $0x548] ss:$24 sps:$4 sm:$0xff]  }
 0x185   :  { %v3418_v42 = vld [vmem:[%s4805_s1 + $0x250] ss:$24 sps:$4 sm:$0xff]  }
 0x187   :  { %1941 = vmatpush1.bf16.msra.mxu0 %v3331_v43  ;;  %1982 = vmatpush1.bf16.msra.mxu1 %v3334_v46  ;;  %v3423_v43 = vld [vmem:[%s4805_s1 + $0x57c] ss:$24 sps:$4 sm:$0xff]  }
 0x188   :  { %1942 = vmatprep.subr.bf16.mxu0 %v3339_v47  ;;  %1983 = vmatprep.subr.bf16.mxu1 %v3342_v50  ;;  %v3426_v46 = vld [vmem:[%s4805_s1 + $0x284] ss:$24 sps:$4 sm:$0xff]   ;;  %v3421_v47 = vld [vmem:[%s4805_s1 + $0x578] ss:$24 sps:$4 sm:$0xff]  }
 0x189   :  { %v3424_v50 = vld [vmem:[%s4805_s1 + $0x280] ss:$24 sps:$4 sm:$0xff]  }
 0x18b   :  { %1943 = vmatpush1.bf16.msra.mxu0 %v3337_v51  ;;  %1984 = vmatpush1.bf16.msra.mxu1 %v3340_v53  ;;  %v3429_v51 = vld [vmem:[%s4805_s1 + $0x5ac] ss:$24 sps:$4 sm:$0xff]  }
 0x18c   :  { %1994 = vmatprep.subr.bf16.mxu1 %v3345_v55  ;;  %2076 = vmatprep.subr.bf16.mxu0 %v3348_v56  ;;  %v3432_v53 = vld [vmem:[%s4805_s1 + $0x2b4] ss:$24 sps:$4 sm:$0xff]   ;;  %v3430_v55 = vld [vmem:[%s4805_s1 + $0x2b0] ss:$24 sps:$4 sm:$0xff]  }
 0x18d   :  { %v3435_v56 = vld [vmem:[%s4805_s1 + $0x5dc] ss:$24 sps:$4 sm:$0xff]  }
 0x18e   :  { %1945 = vmatmul.mubr.bf16.vlgmr.msra.gmra.mrb[0].mxu0 %v4147_v58  ;;  %1986 = vmatmul.mubr.bf16.vlgmr.msra.gmra.mrb[4].mxu1 %v3944_v48 }
 0x18f   :  { %1995 = vmatpush1.bf16.msra.mxu1 %v3343_v57  ;;  %2026 = vmatprep.mubr.bf16.mxu1 %v3936_v45  ;;  %v3438_v57 = vld [vmem:[%s4805_s1 + $0x2e4] ss:$24 sps:$4 sm:$0xff]  }
 0x190   :  { %2077 = vmatpush1.bf16.msra.mxu0 %v3346_v13  ;;  %2108 = vmatprep.mubr.bf16.mxu0 %v3934_v44  ;;  %v3358_v44 = vld [vmem:[%s4805_s1 + $0x70] ss:$24 sps:$4 sm:$0xff]  }
 0x191   :  { %1996 = vmatprep.subr.bf16.mxu1 %v3351_v38  ;;  %2078 = vmatprep.subr.bf16.mxu0 %v3354_v59  ;;  %v3433_v13 = vld [vmem:[%s4805_s1 + $0x5d8] ss:$24 sps:$4 sm:$0xff]   ;;  %v3441_v59 = vld [vmem:[%s4805_s1 + $0x60c] ss:$24 sps:$4 sm:$0xff]  }
 0x192   :  { %v3436_v38 = vld [vmem:[%s4805_s1 + $0x2e0] ss:$24 sps:$4 sm:$0xff]  }
 0x193   :  { %1997 = vmatpush1.bf16.msra.mxu1 %v3349_v60  ;;  %v3444_v60 = vld [vmem:[%s4805_s1 + $0x314] ss:$24 sps:$4 sm:$0xff]  }
 0x194   :  { %2079 = vmatpush1.bf16.msra.mxu0 %v3352_v61  ;;  %1998 = vmatprep.subr.bf16.mxu1 %v3357_v62  ;;  %v3439_v61 = vld [vmem:[%s4805_s1 + $0x608] ss:$24 sps:$4 sm:$0xff]  }
 0x195   :  { %2080 = vmatprep.subr.bf16.mxu0 %v3360_v63  ;;  %v3442_v62 = vld [vmem:[%s4805_s1 + $0x310] ss:$24 sps:$4 sm:$0xff]   ;;  %v3447_v63 = vld [vmem:[%s4805_s1 + $0x63c] ss:$24 sps:$4 sm:$0xff]  }
 0x197   :  { %1999 = vmatpush1.bf16.msra.mxu1 %v3355_v7  ;;  %v3450_v7 = vld [vmem:[%s4805_s1 + $0x344] ss:$24 sps:$4 sm:$0xff]  }
 0x198   :  { %2081 = vmatpush1.bf16.msra.mxu0 %v3358_v44  ;;  %2000 = vmatprep.subr.bf16.mxu1 %v3363_v9  ;;  %v3445_v44 = vld [vmem:[%s4805_s1 + $0x638] ss:$24 sps:$4 sm:$0xff]  }
 0x199   :  { %2082 = vmatprep.subr.bf16.mxu0 %v3366_v11  ;;  %v3448_v9 = vld [vmem:[%s4805_s1 + $0x340] ss:$24 sps:$4 sm:$0xff]   ;;  %v3453_v11 = vld [vmem:[%s4805_s1 + $0x66c] ss:$24 sps:$4 sm:$0xff]  }
 0x19b   :  { %2001 = vmatpush1.bf16.msra.mxu1 %v3361_v12  ;;  %v3451_v12 = vld [vmem:[%s4805_s1 + $0x668] ss:$24 sps:$4 sm:$0xff]  }
 0x19c   :  { %2083 = vmatpush1.bf16.msra.mxu0 %v3364_v2  ;;  %2002 = vmatprep.subr.bf16.mxu1 %v3369_v0  ;;  %v3454_v2 = vld [vmem:[%s4805_s1 + $0x370] ss:$24 sps:$4 sm:$0xff]  }
 0x19d   :  { %2084 = vmatprep.subr.bf16.mxu0 %v3372_v3  ;;  %v3457_v0 = vld [vmem:[%s4805_s1 + $0x698] ss:$24 sps:$4 sm:$0xff]   ;;  %v3462_v3 = vld [vmem:[%s4805_s1 + $0x3a4] ss:$24 sps:$4 sm:$0xff]  }
 0x19f   :  { %2003 = vmatpush1.bf16.msra.mxu1 %v3367_v4  ;;  %v3460_v4 = vld [vmem:[%s4805_s1 + $0x3a0] ss:$24 sps:$4 sm:$0xff]  }
 0x1a0   :  { %2085 = vmatpush1.bf16.msra.mxu0 %v3370_v14  ;;  %2004 = vmatprep.subr.bf16.mxu1 %v3375_v1  ;;  %v3465_v14 = vld [vmem:[%s4805_s1 + $0x6cc] ss:$24 sps:$4 sm:$0xff]  }
 0x1a1   :  { %2086 = vmatprep.subr.bf16.mxu0 %v3378_v6  ;;  %v3468_v1 = vld [vmem:[%s4805_s1 + $0x3d4] ss:$24 sps:$4 sm:$0xff]   ;;  %v3463_v6 = vld [vmem:[%s4805_s1 + $0x6c8] ss:$24 sps:$4 sm:$0xff]  }
 0x1a3   :  { %2005 = vmatpush1.bf16.msra.mxu1 %v3373_v15  ;;  %v3466_v15 = vld [vmem:[%s4805_s1 + $0x3d0] ss:$24 sps:$4 sm:$0xff]  }
 0x1a4   :  { %2087 = vmatpush1.bf16.msra.mxu0 %v3376_v16  ;;  %2006 = vmatprep.subr.bf16.mxu1 %v3381_v17  ;;  %v3471_v16 = vld [vmem:[%s4805_s1 + $0x6fc] ss:$24 sps:$4 sm:$0xff]  }
 0x1a5   :  { %2088 = vmatprep.subr.bf16.mxu0 %v3384_v8  ;;  %v3474_v17 = vld [vmem:[%s4805_s1 + $0x404] ss:$24 sps:$4 sm:$0xff]   ;;  %v3469_v8 = vld [vmem:[%s4805_s1 + $0x6f8] ss:$24 sps:$4 sm:$0xff]  }
 0x1a7   :  { %2007 = vmatpush1.bf16.msra.mxu1 %v3379_v18  ;;  %v3472_v18 = vld [vmem:[%s4805_s1 + $0x400] ss:$24 sps:$4 sm:$0xff]  }
 0x1a8   :  { %2089 = vmatpush1.bf16.msra.mxu0 %v3382_v5  ;;  %2008 = vmatprep.subr.bf16.mxu1 %v3387_v10  ;;  %v3477_v5 = vld [vmem:[%s4805_s1 + $0x72c] ss:$24 sps:$4 sm:$0xff]  }
 0x1a9   :  { %2090 = vmatprep.subr.bf16.mxu0 %v3390_v19  ;;  %v3480_v10 = vld [vmem:[%s4805_s1 + $0x434] ss:$24 sps:$4 sm:$0xff]   ;;  %v3475_v19 = vld [vmem:[%s4805_s1 + $0x728] ss:$24 sps:$4 sm:$0xff]  }
 0x1ab   :  { %2009 = vmatpush1.bf16.msra.mxu1 %v3385_v20  ;;  %v3478_v20 = vld [vmem:[%s4805_s1 + $0x430] ss:$24 sps:$4 sm:$0xff]  }
 0x1ac   :  { %2091 = vmatpush1.bf16.msra.mxu0 %v3388_v21  ;;  %2010 = vmatprep.subr.bf16.mxu1 %v3393_v22  ;;  %v3483_v21 = vld [vmem:[%s4805_s1 + $0x75c] ss:$24 sps:$4 sm:$0xff]  }
 0x1ad   :  { %2092 = vmatprep.subr.bf16.mxu0 %v3396_v23  ;;  %v3486_v22 = vld [vmem:[%s4805_s1 + $0x464] ss:$24 sps:$4 sm:$0xff]   ;;  %v3481_v23 = vld [vmem:[%s4805_s1 + $0x758] ss:$24 sps:$4 sm:$0xff]  }
 0x1af   :  { %2011 = vmatpush1.bf16.msra.mxu1 %v3391_v24  ;;  %v3484_v24 = vld [vmem:[%s4805_s1 + $0x460] ss:$24 sps:$4 sm:$0xff]  }
 0x1b0   :  { %2093 = vmatpush1.bf16.msra.mxu0 %v3394_v25  ;;  %2012 = vmatprep.subr.bf16.mxu1 %v3399_v26  ;;  %v3489_v25 = vld [vmem:[%s4805_s1 + $0x78c] ss:$24 sps:$4 sm:$0xff]  }
 0x1b1   :  { %2094 = vmatprep.subr.bf16.mxu0 %v3402_v27  ;;  %v3492_v26 = vld [vmem:[%s4805_s1 + $0x494] ss:$24 sps:$4 sm:$0xff]   ;;  %v3487_v27 = vld [vmem:[%s4805_s1 + $0x788] ss:$24 sps:$4 sm:$0xff]  }
 0x1b3   :  { %2013 = vmatpush1.bf16.msra.mxu1 %v3397_v28  ;;  %v3490_v28 = vld [vmem:[%s4805_s1 + $0x490] ss:$24 sps:$4 sm:$0xff]  }
 0x1b4   :  { %2095 = vmatpush1.bf16.msra.mxu0 %v3400_v29  ;;  %2014 = vmatprep.subr.bf16.mxu1 %v3405_v30  ;;  %v3495_v29 = vld [vmem:[%s4805_s1 + $0x7bc] ss:$24 sps:$4 sm:$0xff]  }
 0x1b5   :  { %2096 = vmatprep.subr.bf16.mxu0 %v3408_v31  ;;  %v3498_v30 = vld [vmem:[%s4805_s1 + $0x4c4] ss:$24 sps:$4 sm:$0xff]   ;;  %v3493_v31 = vld [vmem:[%s4805_s1 + $0x7b8] ss:$24 sps:$4 sm:$0xff]  }
 0x1b7   :  { %2015 = vmatpush1.bf16.msra.mxu1 %v3403_v32  ;;  %v3496_v32 = vld [vmem:[%s4805_s1 + $0x4c0] ss:$24 sps:$4 sm:$0xff]  }
 0x1b8   :  { %2097 = vmatpush1.bf16.msra.mxu0 %v3406_v33  ;;  %2016 = vmatprep.subr.bf16.mxu1 %v3411_v34  ;;  %v3501_v33 = vld [vmem:[%s4805_s1 + $0x7ec] ss:$24 sps:$4 sm:$0xff]  }
 0x1b9   :  { %2098 = vmatprep.subr.bf16.mxu0 %v3414_v35  ;;  %v3504_v34 = vld [vmem:[%s4805_s1 + $0x4f4] ss:$24 sps:$4 sm:$0xff]   ;;  %v3499_v35 = vld [vmem:[%s4805_s1 + $0x7e8] ss:$24 sps:$4 sm:$0xff]  }
 0x1bb   :  { %2017 = vmatpush1.bf16.msra.mxu1 %v3409_v36  ;;  %v3502_v36 = vld [vmem:[%s4805_s1 + $0x4f0] ss:$24 sps:$4 sm:$0xff]  }
 0x1bc   :  { %2099 = vmatpush1.bf16.msra.mxu0 %v3412_v37  ;;  %2018 = vmatprep.subr.bf16.mxu1 %v3417_v39  ;;  %v3507_v37 = vld [vmem:[%s4805_s1 + $0x81c] ss:$24 sps:$4 sm:$0xff]  }
 0x1bd   :  { %2100 = vmatprep.subr.bf16.mxu0 %v3420_v40  ;;  %v3510_v39 = vld [vmem:[%s4805_s1 + $0x524] ss:$24 sps:$4 sm:$0xff]   ;;  %v3505_v40 = vld [vmem:[%s4805_s1 + $0x818] ss:$24 sps:$4 sm:$0xff]  }
 0x1bf   :  { %2019 = vmatpush1.bf16.msra.mxu1 %v3415_v41  ;;  %v3508_v41 = vld [vmem:[%s4805_s1 + $0x520] ss:$24 sps:$4 sm:$0xff]  }
 0x1c0   :  { %2101 = vmatpush1.bf16.msra.mxu0 %v3418_v42  ;;  %2020 = vmatprep.subr.bf16.mxu1 %v3423_v43  ;;  %v3513_v42 = vld [vmem:[%s4805_s1 + $0x84c] ss:$24 sps:$4 sm:$0xff]  }
 0x1c1   :  { %2102 = vmatprep.subr.bf16.mxu0 %v3426_v46  ;;  %v3516_v43 = vld [vmem:[%s4805_s1 + $0x554] ss:$24 sps:$4 sm:$0xff]   ;;  %v3511_v46 = vld [vmem:[%s4805_s1 + $0x848] ss:$24 sps:$4 sm:$0xff]  }
 0x1c3   :  { %2021 = vmatpush1.bf16.msra.mxu1 %v3421_v47  ;;  %v3514_v47 = vld [vmem:[%s4805_s1 + $0x550] ss:$24 sps:$4 sm:$0xff]  }
 0x1c4   :  { %2103 = vmatpush1.bf16.msra.mxu0 %v3424_v50  ;;  %2022 = vmatprep.subr.bf16.mxu1 %v3429_v51  ;;  %v3519_v50 = vld [vmem:[%s4805_s1 + $0x87c] ss:$24 sps:$4 sm:$0xff]  }
 0x1c5   :  { %2104 = vmatprep.subr.bf16.mxu0 %v3432_v53  ;;  %v3522_v51 = vld [vmem:[%s4805_s1 + $0x584] ss:$24 sps:$4 sm:$0xff]   ;;  %v3517_v53 = vld [vmem:[%s4805_s1 + $0x878] ss:$24 sps:$4 sm:$0xff]  }
 0x1c7   :  { %2023 = vmatpush1.bf16.msra.mxu1 %v3427_v54  ;;  %v3520_v54 = vld [vmem:[%s4805_s1 + $0x580] ss:$24 sps:$4 sm:$0xff]  }
 0x1c8   :  { %2105 = vmatpush1.bf16.msra.mxu0 %v3430_v55  ;;  %2024 = vmatprep.subr.bf16.mxu1 %v3435_v56  ;;  %v3525_v55 = vld [vmem:[%s4805_s1 + $0x8ac] ss:$24 sps:$4 sm:$0xff]  }
 0x1c9   :  { %2106 = vmatprep.subr.bf16.mxu0 %v3438_v57  ;;  %v3528_v56 = vld [vmem:[%s4805_s1 + $0x5b4] ss:$24 sps:$4 sm:$0xff]   ;;  %v3523_v57 = vld [vmem:[%s4805_s1 + $0x8a8] ss:$24 sps:$4 sm:$0xff]  }
 0x1cb   :  { %2025 = vmatpush1.bf16.msra.mxu1 %v3433_v13  ;;  %v3526_v13 = vld [vmem:[%s4805_s1 + $0x5b0] ss:$24 sps:$4 sm:$0xff]  }
 0x1cc   :  { %2107 = vmatpush1.bf16.msra.mxu0 %v3436_v38  ;;  %2035 = vmatprep.subr.bf16.mxu1 %v3441_v59  ;;  %v3531_v38 = vld [vmem:[%s4805_s1 + $0x8dc] ss:$24 sps:$4 sm:$0xff]  }
 0x1cd   :  { %2117 = vmatprep.subr.bf16.mxu0 %v3444_v60  ;;  %v3534_v59 = vld [vmem:[%s4805_s1 + $0x5e4] ss:$24 sps:$4 sm:$0xff]   ;;  %v3529_v60 = vld [vmem:[%s4805_s1 + $0x8d8] ss:$24 sps:$4 sm:$0xff]  }
 0x1ce   :  { %2027 = vmatmul.mubr.bf16.vlgmr.msra.gmra.mrb[4].mxu1 %v3946_v49 }
 0x1cf   :  { %2109 = vmatmul.mubr.bf16.vlgmr.msra.gmra.mrb[4].mxu0 %v3944_v48  ;;  %2036 = vmatpush1.bf16.msra.mxu1 %v3439_v61  ;;  %v3456_v48 = vld [vmem:[%s4805_s1 + $0x374] ss:$24 sps:$4 sm:$0xff]   ;;  %v3532_v61 = vld [vmem:[%s4805_s1 + $0x5e0] ss:$24 sps:$4 sm:$0xff]  }
 0x1d0   :  { %2067 = vmatprep.mubr.bf16.mxu1 %v3958_v52  ;;  %2118 = vmatpush1.bf16.msra.mxu0 %v3442_v62  ;;  %v3583_v62 = vld [vmem:[%s4806_s3 + $0x40] sm:$0xff]  }
 0x1d1   :  { %2149 = vmatprep.mubr.bf16.mxu0 %v3936_v45  ;;  %2037 = vmatprep.subr.bf16.mxu1 %v3447_v63  ;;  %v3459_v45 = vld [vmem:[%s4805_s1 + $0x69c] ss:$24 sps:$4 sm:$0xff]  }
 0x1d2   :  { %2119 = vmatprep.subr.bf16.mxu0 %v3450_v7  ;;  %v3537_v63 = vld [vmem:[%s4805_s1 + $0x614] ss:$24 sps:$4 sm:$0xff]   ;;  %v3584_v7 = vld [vmem:[%s4806_s3] sm:$0xff]  }
 0x1d3   :  { %2038 = vmatpush1.bf16.msra.mxu1 %v3445_v44  ;;  %v3535_v44 = vld [vmem:[%s4805_s1 + $0x610] ss:$24 sps:$4 sm:$0xff]  }
 0x1d4   :  { %2120 = vmatpush1.bf16.msra.mxu0 %v3448_v9  ;;  %2039 = vmatprep.subr.bf16.mxu1 %v3453_v11  ;;  %v3540_v9 = vld [vmem:[%s4805_s1 + $0x644] ss:$24 sps:$4 sm:$0xff]   ;;  %v3585_v11 = vld [vmem:[%s4806_s3 + $0x48] sm:$0xff]  }
 0x1d5   :  { %2121 = vmatprep.subr.bf16.mxu0 %v3456_v48  ;;  %v3586_v48 = vld [vmem:[%s4806_s3 + $0x8] sm:$0xff]  }
 0x1d7   :  { %2040 = vmatpush1.bf16.msra.mxu1 %v3451_v12  ;;  %v3538_v12 = vld [vmem:[%s4805_s1 + $0x640] ss:$24 sps:$4 sm:$0xff]  }
 0x1d8   :  { %2122 = vmatpush1.bf16.msra.mxu0 %v3454_v2  ;;  %2041 = vmatprep.subr.bf16.mxu1 %v3459_v45  ;;  %v3587_v2 = vld [vmem:[%s4806_s3 + $0x50] sm:$0xff]  }
 0x1d9   :  { %2123 = vmatprep.subr.bf16.mxu0 %v3462_v3  ;;  %v3588_v45 = vld [vmem:[%s4806_s3 + $0x10] sm:$0xff]   ;;  %v3546_v3 = vld [vmem:[%s4805_s1 + $0x6a4] ss:$24 sps:$4 sm:$0xff]  }
 0x1db   :  { %2042 = vmatpush1.bf16.msra.mxu1 %v3457_v0  ;;  %v3589_v0 = vld [vmem:[%s4806_s3 + $0x58] sm:$0xff]  }
 0x1dc   :  { %2124 = vmatpush1.bf16.msra.mxu0 %v3460_v4  ;;  %2043 = vmatprep.subr.bf16.mxu1 %v3465_v14  ;;  %v3590_v4 = vld [vmem:[%s4806_s3 + $0x18] sm:$0xff]  }
 0x1dd   :  { %2125 = vmatprep.subr.bf16.mxu0 %v3468_v1  ;;  %v3544_v14 = vld [vmem:[%s4805_s1 + $0x6a0] ss:$24 sps:$4 sm:$0xff]  }
 0x1de   :  { %v3591_v1 = vld [vmem:[%s4806_s3 + $0x60] sm:$0xff]  }
 0x1df   :  { %2044 = vmatpush1.bf16.msra.mxu1 %v3463_v6  ;;  %v3549_v6 = vld [vmem:[%s4805_s1 + $0x6d4] ss:$24 sps:$4 sm:$0xff]  }
 0x1e0   :  { %2126 = vmatpush1.bf16.msra.mxu0 %v3466_v15  ;;  %2045 = vmatprep.subr.bf16.mxu1 %v3471_v16  ;;  %v3592_v15 = vld [vmem:[%s4806_s3 + $0x20] sm:$0xff]   ;;  %v3547_v16 = vld [vmem:[%s4805_s1 + $0x6d0] ss:$24 sps:$4 sm:$0xff]  }
 0x1e1   :  { %2127 = vmatprep.subr.bf16.mxu0 %v3474_v17  ;;  %v3593_v17 = vld [vmem:[%s4806_s3 + $0x68] sm:$0xff]  }
 0x1e3   :  { %2046 = vmatpush1.bf16.msra.mxu1 %v3469_v8  ;;  %v3552_v8 = vld [vmem:[%s4805_s1 + $0x704] ss:$24 sps:$4 sm:$0xff]  }
 0x1e4   :  { %2128 = vmatpush1.bf16.msra.mxu0 %v3472_v18  ;;  %2047 = vmatprep.subr.bf16.mxu1 %v3477_v5  ;;  %v3594_v18 = vld [vmem:[%s4806_s3 + $0x28] sm:$0xff]   ;;  %v3550_v5 = vld [vmem:[%s4805_s1 + $0x700] ss:$24 sps:$4 sm:$0xff]  }
 0x1e5   :  { %2129 = vmatprep.subr.bf16.mxu0 %v3480_v10  ;;  %v3595_v10 = vld [vmem:[%s4806_s3 + $0x70] sm:$0xff]  }
 0x1e7   :  { %2048 = vmatpush1.bf16.msra.mxu1 %v3475_v19 }
 0x1e8   :  { %2130 = vmatpush1.bf16.msra.mxu0 %v3478_v20  ;;  %2049 = vmatprep.subr.bf16.mxu1 %v3483_v21  ;;  %v3555_v20 = vld [vmem:[%s4805_s1 + $0x734] ss:$24 sps:$4 sm:$0xff]  }
 0x1e9   :  { %2131 = vmatprep.subr.bf16.mxu0 %v3486_v22 }
 0x1eb   :  { %2050 = vmatpush1.bf16.msra.mxu1 %v3481_v23  ;;  %v3596_v23 = vld [vmem:[%s4806_s3 + $0x30] sm:$0xff]  }
 0x1ec   :  { %2132 = vmatpush1.bf16.msra.mxu0 %v3484_v24  ;;  %2051 = vmatprep.subr.bf16.mxu1 %v3489_v25  ;;  %v3553_v25 = vld [vmem:[%s4805_s1 + $0x730] ss:$24 sps:$4 sm:$0xff]  }
 0x1ed   :  { %2133 = vmatprep.subr.bf16.mxu0 %v3492_v26  ;;  %v3597_v26 = vld [vmem:[%s4806_s3 + $0x78] sm:$0xff]  }
 0x1ef   :  { %2052 = vmatpush1.bf16.msra.mxu1 %v3487_v27  ;;  %v3558_v27 = vld [vmem:[%s4805_s1 + $0x764] ss:$24 sps:$4 sm:$0xff]  }
 0x1f0   :  { %2134 = vmatpush1.bf16.msra.mxu0 %v3490_v28  ;;  %2053 = vmatprep.subr.bf16.mxu1 %v3495_v29  ;;  %v3598_v28 = vld [vmem:[%s4806_s3 + $0x38] sm:$0xff]  }
 0x1f1   :  { %2135 = vmatprep.subr.bf16.mxu0 %v3498_v30  ;;  %v3556_v29 = vld [vmem:[%s4805_s1 + $0x760] ss:$24 sps:$4 sm:$0xff]  }
 0x1f2   :  { %v3599_v30 = vld [vmem:[%s4806_s3 + $0xc0] sm:$0xff]  }
 0x1f3   :  { %2054 = vmatpush1.bf16.msra.mxu1 %v3493_v31  ;;  %v3561_v31 = vld [vmem:[%s4805_s1 + $0x794] ss:$24 sps:$4 sm:$0xff]  }
 0x1f4   :  { %2136 = vmatpush1.bf16.msra.mxu0 %v3496_v32  ;;  %2055 = vmatprep.subr.bf16.mxu1 %v3501_v33  ;;  %v3559_v32 = vld [vmem:[%s4805_s1 + $0x790] ss:$24 sps:$4 sm:$0xff]   ;;  %v3564_v33 = vld [vmem:[%s4805_s1 + $0x7c4] ss:$24 sps:$4 sm:$0xff]  }
 0x1f5   :  { %2137 = vmatprep.subr.bf16.mxu0 %v3504_v34  ;;  %v3562_v34 = vld [vmem:[%s4805_s1 + $0x7c0] ss:$24 sps:$4 sm:$0xff]  }
 0x1f7   :  { %2056 = vmatpush1.bf16.msra.mxu1 %v3499_v35  ;;  %v3567_v35 = vld [vmem:[%s4805_s1 + $0x7f4] ss:$24 sps:$4 sm:$0xff]  }
 0x1f8   :  { %2138 = vmatpush1.bf16.msra.mxu0 %v3502_v36  ;;  %2057 = vmatprep.subr.bf16.mxu1 %v3507_v37  ;;  %v3565_v36 = vld [vmem:[%s4805_s1 + $0x7f0] ss:$24 sps:$4 sm:$0xff]   ;;  %v3570_v37 = vld [vmem:[%s4805_s1 + $0x824] ss:$24 sps:$4 sm:$0xff]  }
 0x1f9   :  { %2139 = vmatprep.subr.bf16.mxu0 %v3510_v39  ;;  %v3568_v39 = vld [vmem:[%s4805_s1 + $0x820] ss:$24 sps:$4 sm:$0xff]  }
 0x1fb   :  { %2058 = vmatpush1.bf16.msra.mxu1 %v3505_v40  ;;  %v3573_v40 = vld [vmem:[%s4805_s1 + $0x854] ss:$24 sps:$4 sm:$0xff]  }
 0x1fc   :  { %2140 = vmatpush1.bf16.msra.mxu0 %v3508_v41  ;;  %2059 = vmatprep.subr.bf16.mxu1 %v3513_v42  ;;  %v3571_v41 = vld [vmem:[%s4805_s1 + $0x850] ss:$24 sps:$4 sm:$0xff]   ;;  %v3576_v42 = vld [vmem:[%s4805_s1 + $0x884] ss:$24 sps:$4 sm:$0xff]  }
 0x1fd   :  { %2141 = vmatprep.subr.bf16.mxu0 %v3516_v43  ;;  %v3574_v43 = vld [vmem:[%s4805_s1 + $0x880] ss:$24 sps:$4 sm:$0xff]  }
 0x1ff   :  { %2060 = vmatpush1.bf16.msra.mxu1 %v3511_v46  ;;  %v3579_v46 = vld [vmem:[%s4805_s1 + $0x8b4] ss:$24 sps:$4 sm:$0xff]  }
 0x200   :  { %2142 = vmatpush1.bf16.msra.mxu0 %v3514_v47  ;;  %2061 = vmatprep.subr.bf16.mxu1 %v3519_v50  ;;  %v3577_v47 = vld [vmem:[%s4805_s1 + $0x8b0] ss:$24 sps:$4 sm:$0xff]   ;;  %v3582_v50 = vld [vmem:[%s4805_s1 + $0x8e4] ss:$24 sps:$4 sm:$0xff]  }
 0x201   :  { %2143 = vmatprep.subr.bf16.mxu0 %v3522_v51  ;;  %v3580_v51 = vld [vmem:[%s4805_s1 + $0x8e0] ss:$24 sps:$4 sm:$0xff]  }
 0x203   :  { %2062 = vmatpush1.bf16.msra.mxu1 %v3517_v53  ;;  %v360_v53 = vlaneseq }
 0x204   :  { %2144 = vmatpush1.bf16.msra.mxu0 %v3520_v54  ;;  %2063 = vmatprep.subr.bf16.mxu1 %v3525_v55 }
 0x205   :  { %2145 = vmatprep.subr.bf16.mxu0 %v3528_v56  ;;  %v4687_v54 = vshrl.u32 %v360_v53, 7  ;;  %v4693_v56 = vld [vmem:[%s4807_s2] sm:$0x3f] }
 0x207   :  { %2064 = vmatpush1.bf16.msra.mxu1 %v3523_v57  ;;  %v362_v55 = vsub.s32 0, %v4687_v54  ;;  %v366_v57 = vsub.s32 1, %v4687_v54  ;;  %v378_v53 = vsub.s32 4, %v4687_v54 }
 0x208   :  { %2146 = vmatpush1.bf16.msra.mxu0 %v3526_v13  ;;  %2065 = vmatprep.subr.bf16.mxu1 %v3531_v38 }
 0x209   :  { %2147 = vmatprep.subr.bf16.mxu0 %v3534_v59  ;;  %v363_v13 = vrot.slane %v4693_v56, %v362_v55  ;;  %v367_v38 = vrot.slane %v4693_v56, %v366_v57  ;;  %v382_v55 = vsub.s32 5, %v4687_v54  ;;  %v379_v57 = vrot.slane %v4693_v56, %v378_v53 }
 0x20b   :  { %2066 = vmatpush1.bf16.msra.mxu1 %v3529_v60 }
 0x20c   :  { %2148 = vmatpush1.bf16.msra.mxu0 %v3532_v61  ;;  %3057 = vmatprep.subr.bf16.mxu1 %v3583_v62 }
 0x20d   :  { %2158 = vmatprep.subr.bf16.mxu0 %v3537_v63 }
 0x20e   :  { %2068 = vmatmul.mubr.bf16.vlgmr.msra.gmra.mrb[4].mxu1 %v4147_v58 }
 0x20f   :  { %2150 = vmatmul.mubr.bf16.vlgmr.msra.gmra.mrb[4].mxu0 %v3946_v49  ;;  %3058 = vmatpush3.bf16.msra.mxu1 %v3584_v7  ;;  %v3543_v49 = vld [vmem:[%s4805_s1 + $0x674] ss:$24 sps:$4 sm:$0xff]  }
 0x210   :  { %2159 = vmatpush1.bf16.msra.mxu0 %v3535_v44  ;;  %2190 = vmatprep.mubr.bf16.mxu0 %v3958_v52  ;;  %v3541_v52 = vld [vmem:[%s4805_s1 + $0x670] ss:$24 sps:$4 sm:$0xff]  }
 0x211   :  { %2160 = vmatprep.subr.bf16.mxu0 %v3540_v9  ;;  %3059 = vmatprep.subr.bf16.mxu1 %v3585_v11 }
 0x213   :  { %3060 = vmatpush3.bf16.msra.mxu1 %v3586_v48 }
 0x214   :  { %2161 = vmatpush1.bf16.msra.mxu0 %v3538_v12  ;;  %3061 = vmatprep.subr.bf16.mxu1 %v3587_v2  ;;  %v3600_v12 = vld [vmem:[%s4806_s3 + $0x80] sm:$0xff]  }
 0x215   :  { %2162 = vmatprep.subr.bf16.mxu0 %v3543_v49  ;;  %v3601_v49 = vld [vmem:[%s4806_s3 + $0xc8] sm:$0xff]  }
 0x217   :  { %3062 = vmatpush3.bf16.msra.mxu1 %v3588_v45  ;;  %v3602_v45 = vld [vmem:[%s4806_s3 + $0x88] sm:$0xff]  }
 0x218   :  { %2163 = vmatpush1.bf16.msra.mxu0 %v3541_v52  ;;  %3063 = vmatprep.subr.bf16.mxu1 %v3589_v0  ;;  %v3603_v52 = vld [vmem:[%s4806_s3 + $0xd0] sm:$0xff]  }
 0x219   :  { %2164 = vmatprep.subr.bf16.mxu0 %v3546_v3  ;;  %v3604_v0 = vld [vmem:[%s4806_s3 + $0x90] sm:$0xff]   ;;  %v3605_v3 = vld [vmem:[%s4806_s3 + $0xd8] sm:$0xff]  }
 0x21b   :  { %3064 = vmatpush3.bf16.msra.mxu1 %v3590_v4  ;;  %v3606_v4 = vld [vmem:[%s4806_s3 + $0x98] sm:$0xff]  }
 0x21c   :  { %2165 = vmatpush1.bf16.msra.mxu0 %v3544_v14  ;;  %3065 = vmatprep.subr.bf16.mxu1 %v3591_v1  ;;  %v3607_v14 = vld [vmem:[%s4806_s3 + $0xe0] sm:$0xff]  }
 0x21d   :  { %2166 = vmatprep.subr.bf16.mxu0 %v3549_v6  ;;  %v3608_v1 = vld [vmem:[%s4806_s3 + $0xa0] sm:$0xff]   ;;  %v3609_v6 = vld [vmem:[%s4806_s3 + $0xe8] sm:$0xff]  }
 0x21f   :  { %3066 = vmatpush3.bf16.msra.mxu1 %v3592_v15  ;;  %v3610_v15 = vld [vmem:[%s4806_s3 + $0xa8] sm:$0xff]  }
 0x220   :  { %2167 = vmatpush1.bf16.msra.mxu0 %v3547_v16  ;;  %3067 = vmatprep.subr.bf16.mxu1 %v3593_v17  ;;  %v3611_v16 = vld [vmem:[%s4806_s3 + $0xf0] sm:$0xff]  }
 0x221   :  { %v4610_v19 = vpop.f32.mrb[0].mxu1  ;;  %2168 = vmatprep.subr.bf16.mxu0 %v3552_v8  ;;  %v3612_v17 = vld [vmem:[%s4806_s3 + $0xb0] sm:$0xff]   ;;  %v3613_v8 = vld [vmem:[%s4806_s3 + $0xf8] sm:$0xff]  }
 0x222   :  { %v4615_v21 = vpop.f32.mrb[1].mxu1  ;;  %v1865_v59 = vadd.f32 %v4610_v19, %v363_v13  ;;  %v374_v19 = vsub.s32 3, %v4687_v54  ;;  %v383_v13 = vrot.slane %v4693_v56, %v382_v55 }
 0x223   :  { %v1868_v22 = vpop.f32.mrb[2].mxu1  ;;  %3068 = vmatpush3.bf16.msra.mxu1 %v3594_v18  ;;  %v3614_v18 = vld [vmem:[%s4806_s3 + $0xb8] sm:$0xff]  }
 0x224   :  { %2169 = vmatpush1.bf16.msra.mxu0 %v3550_v5  ;;  %v1869_v24 = vpop.f32.mrb[3].mxu1  ;;  %3069 = vmatprep.subr.bf16.mxu1 %v3595_v10  ;;  %v3615_v5 = vld [vmem:[%s4806_s3 + $0x140] sm:$0xff]   ;;  %v370_v10 = vsub.s32 2, %v4687_v54 }
 0x225   :  { %2170 = vmatprep.subr.bf16.mxu0 %v3555_v20 }
 0x226   :  { %v371_v20 = vrot.slane %v4693_v56, %v370_v10 }
 0x227   :  { %3070 = vmatpush3.bf16.msra.mxu1 %v3596_v23 }
 0x228   :  { %2171 = vmatpush1.bf16.msra.mxu0 %v3553_v25  ;;  %3071 = vmatprep.subr.bf16.mxu1 %v3597_v26 }
 0x229   :  { %2172 = vmatprep.subr.bf16.mxu0 %v3558_v27 }
 0x22b   :  { %3072 = vmatpush3.bf16.msra.mxu1 %v3598_v28 }
 0x22c   :  { %2173 = vmatpush1.bf16.msra.mxu0 %v3556_v29  ;;  %3079 = vmatprep.subr.bf16.mxu1 %v3599_v30 }
 0x22d   :  { %2174 = vmatprep.subr.bf16.mxu0 %v3561_v31  ;;  %v3616_v31 = vld [vmem:[%s4806_s3 + $0x100] sm:$0xff]  }
 0x230   :  { %2175 = vmatpush1.bf16.msra.mxu0 %v3559_v32 }
 0x231   :  { %2176 = vmatprep.subr.bf16.mxu0 %v3564_v33  ;;  %v3617_v33 = vld [vmem:[%s4806_s3 + $0x148] sm:$0xff]  }
 0x234   :  { %2177 = vmatpush1.bf16.msra.mxu0 %v3562_v34  ;;  %v3618_v34 = vld [vmem:[%s4806_s3 + $0x108] sm:$0xff]  }
 0x235   :  { %2178 = vmatprep.subr.bf16.mxu0 %v3567_v35  ;;  %v3619_v35 = vld [vmem:[%s4806_s3 + $0x150] sm:$0xff]  }
 0x238   :  { %2179 = vmatpush1.bf16.msra.mxu0 %v3565_v36  ;;  %v3620_v36 = vld [vmem:[%s4806_s3 + $0x110] sm:$0xff]  }
 0x239   :  { %2180 = vmatprep.subr.bf16.mxu0 %v3570_v37  ;;  %v3621_v37 = vld [vmem:[%s4806_s3 + $0x158] sm:$0xff]  }
 0x23c   :  { %2181 = vmatpush1.bf16.msra.mxu0 %v3568_v39  ;;  %v3622_v39 = vld [vmem:[%s4806_s3 + $0x118] sm:$0xff]  }
 0x23d   :  { %2182 = vmatprep.subr.bf16.mxu0 %v3573_v40  ;;  %v3623_v40 = vld [vmem:[%s4806_s3 + $0x160] sm:$0xff]  }
 0x240   :  { %2183 = vmatpush1.bf16.msra.mxu0 %v3571_v41  ;;  %v3624_v41 = vld [vmem:[%s4806_s3 + $0x120] sm:$0xff]  }
 0x241   :  { %2184 = vmatprep.subr.bf16.mxu0 %v3576_v42  ;;  %v3625_v42 = vld [vmem:[%s4806_s3 + $0x168] sm:$0xff]  }
 0x244   :  { %2185 = vmatpush1.bf16.msra.mxu0 %v3574_v43  ;;  %v3626_v43 = vld [vmem:[%s4806_s3 + $0x128] sm:$0xff]  }
 0x245   :  { %2186 = vmatprep.subr.bf16.mxu0 %v3579_v46  ;;  %v3627_v46 = vld [vmem:[%s4806_s3 + $0x170] sm:$0xff]  }
 0x248   :  { %2187 = vmatpush1.bf16.msra.mxu0 %v3577_v47  ;;  %v3628_v47 = vld [vmem:[%s4806_s3 + $0x130] sm:$0xff]  }
 0x249   :  { %2188 = vmatprep.subr.bf16.mxu0 %v3582_v50  ;;  %v3629_v50 = vld [vmem:[%s4806_s3 + $0x178] sm:$0xff]  }
 0x24c   :  { %2189 = vmatpush1.bf16.msra.mxu0 %v3580_v51  ;;  %v3630_v51 = vld [vmem:[%s4806_s3 + $0x138] sm:$0xff]  }
 0x24f   :  { %2191 = vmatmul.mubr.bf16.vlgmr.msra.gmra.mrb[4].mxu0 %v4147_v58  ;;  %v1867_v58 = vadd.f32 %v4615_v21, %v367_v38  ;;  %v375_v21 = vrot.slane %v4693_v56, %v374_v19 }
 0x261   :  { %v1946_v60 = vpop.f32.mrb[0].mxu0 }
 0x262   :  { %v3124_v61 = vadd.f32 %v1946_v60, %v1865_v59  ;;  %v1948_v62 = vpop.f32.mrb[1].mxu0 }
 0x263   :  { %v3126_v63 = vadd.f32 %v1948_v62, %v1867_v58  ;;  %v1950_v7 = vpop.f32.mrb[2].mxu0 }
 0x264   :  { %3633 = vtanh.f32 %v3124_v61  ;;  %v1951_v44 = vpop.f32.mrb[3].mxu0 }
 0x265   :  { %3635 = vtanh.f32 %v3126_v63 }
 0x26e   :  { %v3634_v9 = vpop.eup %3633 }
 0x26f   :  { %v3636_v11 = vpop.eup %3635  ;;  %v2205_v2 = vpack.c.bf16 %v3634_v9, %v3634_v9 }
 0x270   :  { %v2206_v48 = vpack.c.bf16 %v3636_v11, %v3636_v11 }
 0x272   :  { %2627 = vmatprep.mubr.bf16.mxu1 %v2206_v48 }
 0x273   :  { %2628 = vmatmul.mubr.bf16.vlgmr.msra.gmra.mrb[8].mxu1 %v2205_v2 }
 0x274   :  { %3080 = vmatpush3.bf16.msra.mxu1 %v3600_v12 }
 0x275   :  { %3081 = vmatprep.subr.bf16.mxu1 %v3601_v49 }
 0x278   :  { %3082 = vmatpush3.bf16.msra.mxu1 %v3602_v45 }
 0x279   :  { %3083 = vmatprep.subr.bf16.mxu1 %v3603_v52 }
 0x27c   :  { %3084 = vmatpush3.bf16.msra.mxu1 %v3604_v0 }
 0x27d   :  { %3085 = vmatprep.subr.bf16.mxu1 %v3605_v3 }
 0x280   :  { %3086 = vmatpush3.bf16.msra.mxu1 %v3606_v4 }
 0x281   :  { %3087 = vmatprep.subr.bf16.mxu1 %v3607_v14 }
 0x284   :  { %3088 = vmatpush3.bf16.msra.mxu1 %v3608_v1 }
 0x285   :  { %3089 = vmatprep.subr.bf16.mxu1 %v3609_v6 }
 0x288   :  { %3090 = vmatpush3.bf16.msra.mxu1 %v3610_v15 }
 0x289   :  { %3091 = vmatprep.subr.bf16.mxu1 %v3611_v16 }
 0x28c   :  { %3092 = vmatpush3.bf16.msra.mxu1 %v3612_v17 }
 0x28d   :  { %3093 = vmatprep.subr.bf16.mxu1 %v3613_v8 }
 0x290   :  { %3094 = vmatpush3.bf16.msra.mxu1 %v3614_v18 }
 0x291   :  { %3101 = vmatprep.subr.bf16.mxu1 %v3615_v5 }
 0x2e1   :  { %v2069_v22 = vpop.f32.mrb[4].mxu1 }
 0x2e2   :  { %v3127_v23 = vadd.f32 %v2069_v22, %v371_v20  ;;  %v2071_v24 = vpop.f32.mrb[5].mxu1 }
 0x2e3   :  { %v3128_v25 = vadd.f32 %v2071_v24, %v375_v21  ;;  %v2073_v26 = vpop.f32.mrb[6].mxu1 }
 0x2e4   :  { %3637 = vtanh.f32 %v3127_v23  ;;  %v2074_v27 = vpop.f32.mrb[7].mxu1 }
 0x2e5   :  { %3639 = vtanh.f32 %v3128_v25 }
 0x2ee   :  { %v3638_v28 = vpop.eup %3637 }
 0x2ef   :  { %v3640_v29 = vpop.eup %3639  ;;  %v2207_v32 = vpack.c.bf16 %v3638_v28, %v3638_v28 }
 0x2f0   :  { %v2208_v30 = vpack.c.bf16 %v3640_v29, %v3640_v29 }
 0x2f2   :  { %2667 = vmatprep.mubr.bf16.mxu1 %v2208_v30 }
 0x2f3   :  { %2668 = vmatmul.mubr.bf16.vlgmr.msra.gmra.mrb[12].mxu1 %v2207_v32 }
 0x2f4   :  { %3102 = vmatpush3.bf16.msra.mxu1 %v3616_v31 }
 0x2f5   :  { %3103 = vmatprep.subr.bf16.mxu1 %v3617_v33 }
 0x2f8   :  { %3104 = vmatpush3.bf16.msra.mxu1 %v3618_v34 }
 0x2f9   :  { %3105 = vmatprep.subr.bf16.mxu1 %v3619_v35 }
 0x2fc   :  { %3106 = vmatpush3.bf16.msra.mxu1 %v3620_v36 }
 0x2fd   :  { %3107 = vmatprep.subr.bf16.mxu1 %v3621_v37 }
 0x300   :  { %3108 = vmatpush3.bf16.msra.mxu1 %v3622_v39 }
 0x301   :  { %3109 = vmatprep.subr.bf16.mxu1 %v3623_v40 }
 0x304   :  { %3110 = vmatpush3.bf16.msra.mxu1 %v3624_v41 }
 0x305   :  { %3111 = vmatprep.subr.bf16.mxu1 %v3625_v42 }
 0x308   :  { %3112 = vmatpush3.bf16.msra.mxu1 %v3626_v43 }
 0x309   :  { %3113 = vmatprep.subr.bf16.mxu1 %v3627_v46 }
 0x30c   :  { %3114 = vmatpush3.bf16.msra.mxu1 %v3628_v47 }
 0x30d   :  { %3115 = vmatprep.subr.bf16.mxu1 %v3629_v50 }
 0x310   :  { %3116 = vmatpush3.bf16.msra.mxu1 %v3630_v51 }
 0x322   :  { %v2192_v38 = vpop.f32.mrb[4].mxu0 }
 0x323   :  { %v3129_v59 = vadd.f32 %v2192_v38, %v379_v57  ;;  %v2194_v58 = vpop.f32.mrb[5].mxu0 }
 0x324   :  { %v3130_v60 = vadd.f32 %v2194_v58, %v383_v13  ;;  %v2196_v61 = vpop.f32.mrb[6].mxu0 }
 0x325   :  { %3641 = vtanh.f32 %v3129_v59  ;;  %v2197_v62 = vpop.f32.mrb[7].mxu0 }
 0x326   :  { %3643 = vtanh.f32 %v3130_v60 }
 0x32f   :  { %v3642_v63 = vpop.eup %3641 }
 0x330   :  { %v3644_v7 = vpop.eup %3643  ;;  %v2209_v9 = vpack.c.bf16 %v3642_v63, %v3642_v63 }
 0x331   :  { %v2210_v44 = vpack.c.bf16 %v3644_v7, %v3644_v7 }
 0x333   :  { %2707 = vmatprep.mubr.bf16.mxu1 %v2210_v44 }
 0x334   :  { %2708 = vmatmul.mubr.bf16.vlgmr.msra.gmra.mrb[16].mxu1 %v2209_v9 }
 0x346   :  { %v3073_v11 = vpop.f32.mrb[8].mxu1 }
 0x347   :  { %v3074_v54 = vpop.f32.mrb[9].mxu1 }
 0x348   :  { %v3075_v48 = vadd.f32 %v3074_v54, %v3073_v11  ;;  %v3076_v12 = vpop.f32.mrb[10].mxu1 }
 0x349   :  { %v3077_v2 = vpop.f32.mrb[11].mxu1 }
 0x3c6   :  { %v3095_v56 = vpop.f32.mrb[12].mxu1 }
 0x3c7   :  { %v3096_v49 = vpop.f32.mrb[13].mxu1 }
 0x3c8   :  { %v3097_v45 = vadd.f32 %v3096_v49, %v3095_v56  ;;  %v3098_v52 = vpop.f32.mrb[14].mxu1 }
 0x3c9   :  { %v3099_v0 = vpop.f32.mrb[15].mxu1 }
 0x3ca   :  { %v2670_v3 = vadd.f32 %v3097_v45, %v3075_v48 }
 0x407   :  { %v3117_v4 = vpop.f32.mrb[16].mxu1 }
 0x408   :  { %v3118_v14 = vpop.f32.mrb[17].mxu1 }
 0x409   :  { %v3119_v1 = vadd.f32 %v3118_v14, %v3117_v4  ;;  %v3120_v6 = vpop.f32.mrb[18].mxu1 }
 0x40a   :  { %v3121_v15 = vpop.f32.mrb[19].mxu1 }
 0x40b   :  { %v2710_v16 = vadd.f32 %v3119_v1, %v2670_v3 }
 0x40d   :  { %v2715_v17 = vpack.c.bf16 %v2710_v16, %v2710_v16 }
 0x40f   :  { %2716 = vst [vmem:[%s4808_s4] sm:$0xf] %v2715_v17 }

</bundles_post_ra>
